<compile_context>
chip_gen: v6e
topology: v6e:2x2x1
jax: 0.10.0
libtpu: 0.0.40
codegen_flags: <defaults>
</compile_context>

<pallas_src>
import functools
import math

import jax
import jax.numpy as jnp
from jax import lax
from jax.experimental import pallas as pl
from jax.experimental.pallas import tpu as pltpu


LN_EPS = 1e-6                        # timm ViT LayerNorm eps (torch default is 1e-5)


def _vmem_limit_bytes():
    """Per-generation scoped VMEM limit: ~3/4 of physical, capped at 100 MiB.
    (v5e/v6e: 128 MiB -> 96 MiB; v7x: 64 MiB -> 48 MiB)."""
    try:
        cap = pltpu.get_tpu_info().vmem_capacity_bytes
        return int(min(cap * 3 // 4, 100 * 1024 * 1024))
    except Exception:
        return 32 * 1024 * 1024       # conservative fallback


_VMEM_LIMIT = _vmem_limit_bytes()

# Set at startup by _probe_buffered_support(); False => plain double-buffered specs.
_BUFFERED_OK = False


def _probe_buffered_support():
    """Probe whether BlockSpec(pipeline_mode=pl.Buffered(1)) lowers on this jax;
    used to single-buffer grid-constant weights (saves VMEM). Fallback is safe."""
    if not hasattr(pl, "Buffered"):
        return False
    try:
        def k(w_ref, x_ref, o_ref):
            o_ref[...] = x_ref[...] + w_ref[...]

        out = pl.pallas_call(
            k,
            out_shape=jax.ShapeDtypeStruct((16, 128), jnp.float32),
            grid=(2,),
            in_specs=[
                pl.BlockSpec((8, 128), lambda i: (0, 0),
                             pipeline_mode=pl.Buffered(1)),
                pl.BlockSpec((8, 128), lambda i: (i, 0)),
            ],
            out_specs=pl.BlockSpec((8, 128), lambda i: (i, 0)),
        )(jnp.ones((8, 128), jnp.float32), jnp.zeros((16, 128), jnp.float32))
        jax.block_until_ready(out)
        return True
    except Exception:
        return False


def _wspec(shape, index_map):
    """BlockSpec for grid-constant weights: single-buffered when supported."""
    if _BUFFERED_OK:
        return pl.BlockSpec(shape, index_map, pipeline_mode=pl.Buffered(1))
    return pl.BlockSpec(shape, index_map)


# ----------------------------------------------------------------------------
# In-kernel helpers
# ----------------------------------------------------------------------------

def _ln(x, g, b, eps=LN_EPS):
    mean = jnp.mean(x, axis=-1, keepdims=True)
    xc = x - mean
    var = jnp.mean(xc * xc, axis=-1, keepdims=True)
    return xc * lax.rsqrt(var + eps) * g + b


def _gelu_tanh(x):
    # TODO(synk): torch nn.GELU defaults to exact erf; tanh approximation used
    # here (diff ~1e-3) because erf has no guaranteed Mosaic lowering.
    c = math.sqrt(2.0 / math.pi)
    return 0.5 * x * (1.0 + jnp.tanh(c * (x + 0.044715 * x * x * x)))


# ----------------------------------------------------------------------------
# Kernel: patch-embed GEMM + mask mix + [cls, dist] concat + pos-embed
# ----------------------------------------------------------------------------

def _embed_kernel(p_ref, m_ref, pw_ref, pb_ref, cls_ref, dist_ref,
                  maskemb_ref, pos_ref, o_ref):
    patches = p_ref[0]                                           # (L, P) f32
    emb = jnp.dot(patches.astype(jnp.bfloat16), pw_ref[...],
                  preferred_element_type=jnp.float32) + pb_ref[...]   # (L, D)
    m = m_ref[0]                                                 # (L, 1)
    mixed = emb * m + (1.0 - m) * maskemb_ref[...]
    # single full-tile store (no masked sub-sliced stores)
    tokens = jnp.concatenate([cls_ref[...], dist_ref[...], mixed], axis=0)
    o_ref[0] = tokens + pos_ref[0]


def embed_tokens(patches, mask, params, cfg):
    B, L, P = patches.shape
    D = cfg["embed_dim"]
    Ntok = L + cfg["cls_token_num"]
    return pl.pallas_call(
        _embed_kernel,
        out_shape=jax.ShapeDtypeStruct((B, Ntok, D), jnp.float32),
        grid=(B,),
        in_specs=[
            pl.BlockSpec((1, L, P), lambda b: (b, 0, 0)),
            pl.BlockSpec((1, L, 1), lambda b: (b, 0, 0)),
            _wspec((P, D), lambda b: (0, 0)),
            _wspec((1, D), lambda b: (0, 0)),
            _wspec((1, D), lambda b: (0, 0)),
            _wspec((1, D), lambda b: (0, 0)),
            _wspec((1, D), lambda b: (0, 0)),
            _wspec((1, Ntok, D), lambda b: (0, 0, 0)),
        ],
        out_specs=pl.BlockSpec((1, Ntok, D), lambda b: (b, 0, 0)),
        compiler_params=pltpu.CompilerParams(
            dimension_semantics=("parallel",),
            vmem_limit_bytes=_VMEM_LIMIT),
    )(patches, mask, params["patch_w"], params["patch_b"], params["cls_token"],
      params["dist_token"], params["mask_embed"], params["pos_embed"])


# ----------------------------------------------------------------------------
# Kernel: ALL transformer blocks fused in one pallas_call.
# grid = (B, depth); depth is the inner "arbitrary" axis.  The token activation
# is carried in the resident output block (same block index across depth), so
# layer l+1 weights are prefetched by the BlockSpec pipeline while layer l runs.
# ----------------------------------------------------------------------------

def _blocks_kernel(x_ref, n1g, n1b, qkvw, qkvb, projw, projb, n2g, n2b,
                   fc1w, fc1b, fc2w, fc2b, o_ref, *, heads):
    l = pl.program_id(1)

    @pl.when(l == 0)
    def _():
        o_ref[0] = x_ref[0]           # seed the layer carry from the embeddings

    x = o_ref[0]                      # (N, D) f32, carried across layers
    N, D = x.shape
    dh = D // heads

    # --- LN1 + fused QKV GEMM (attention scale pre-folded into q columns) ---
    y = _ln(x, n1g[0], n1b[0])
    qkv = jnp.dot(y.astype(jnp.bfloat16), qkvw[0],
                  preferred_element_type=jnp.float32) + qkvb[0]        # (N, 3D)

    # --- per-head attention; contexts concatenated, ONE output-proj GEMM ---
    # TODO(synk): at base config (dh=64) the head slices are not 128-lane
    # aligned; a (heads, N, dh) batched layout would remove per-head shuffles.
    ctxs = []
    for h in range(heads):
        qh = qkv[:, h * dh:(h + 1) * dh].astype(jnp.bfloat16)
        kh = qkv[:, D + h * dh:D + (h + 1) * dh].astype(jnp.bfloat16)
        vh = qkv[:, 2 * D + h * dh:2 * D + (h + 1) * dh].astype(jnp.bfloat16)
        s = lax.dot_general(qh, kh, (((1,), (1,)), ((), ())),
                            preferred_element_type=jnp.float32)        # (N, N)
        s = s - jnp.max(s, axis=-1, keepdims=True)
        p = jnp.exp(s)
        p = p * pl.reciprocal(jnp.sum(p, axis=-1, keepdims=True), approx=True)
        ctxs.append(jnp.dot(p.astype(jnp.bfloat16), vh,
                            preferred_element_type=jnp.float32))        # (N, dh)
    ctx = jnp.concatenate(ctxs, axis=-1)                                # (N, D)
    attn = jnp.dot(ctx.astype(jnp.bfloat16), projw[0],
                   preferred_element_type=jnp.float32) + projb[0]
    x = x + attn

    # --- LN2 + MLP + residual ---
    y = _ln(x, n2g[0], n2b[0])
    h1 = jnp.dot(y.astype(jnp.bfloat16), fc1w[0],
                 preferred_element_type=jnp.float32) + fc1b[0]
    h1 = _gelu_tanh(h1)
    h2 = jnp.dot(h1.astype(jnp.bfloat16), fc2w[0],
                 preferred_element_type=jnp.float32) + fc2b[0]
    o_ref[0] = x + h2


def transformer_blocks(x, bp, heads, depth):
    B, Ntok, D = x.shape
    H3 = 3 * D
    Dh = bp["fc1_w"].shape[-1]
    # TODO(synk): on v7x with B == 1 one TensorCore idles; would need a second
    # parallel axis (token tiles) to split the work across the 2 cores.
    return pl.pallas_call(
        functools.partial(_blocks_kernel, heads=heads),
        out_shape=jax.ShapeDtypeStruct((B, Ntok, D), jnp.float32),
        grid=(B, depth),
        in_specs=[
            pl.BlockSpec((1, Ntok, D), lambda b, l: (b, 0, 0)),
            pl.BlockSpec((1, 1, D), lambda b, l: (l, 0, 0)),
            pl.BlockSpec((1, 1, D), lambda b, l: (l, 0, 0)),
            pl.BlockSpec((1, D, H3), lambda b, l: (l, 0, 0)),
            pl.BlockSpec((1, 1, H3), lambda b, l: (l, 0, 0)),
            pl.BlockSpec((1, D, D), lambda b, l: (l, 0, 0)),
            pl.BlockSpec((1, 1, D), lambda b, l: (l, 0, 0)),
            pl.BlockSpec((1, 1, D), lambda b, l: (l, 0, 0)),
            pl.BlockSpec((1, 1, D), lambda b, l: (l, 0, 0)),
            pl.BlockSpec((1, D, Dh), lambda b, l: (l, 0, 0)),
            pl.BlockSpec((1, 1, Dh), lambda b, l: (l, 0, 0)),
            pl.BlockSpec((1, Dh, D), lambda b, l: (l, 0, 0)),
            pl.BlockSpec((1, 1, D), lambda b, l: (l, 0, 0)),
        ],
        out_specs=pl.BlockSpec((1, Ntok, D), lambda b, l: (b, 0, 0)),
        compiler_params=pltpu.CompilerParams(
            dimension_semantics=("parallel", "arbitrary"),
            vmem_limit_bytes=_VMEM_LIMIT),
    )(x, bp["n1_g"], bp["n1_b"], bp["qkv_w"], bp["qkv_b"], bp["proj_w"],
      bp["proj_b"], bp["n2_g"], bp["n2_b"], bp["fc1_w"], bp["fc1_b"],
      bp["fc2_w"], bp["fc2_b"])


# ----------------------------------------------------------------------------
# Kernel: final LayerNorm + 2-layer prediction head (Linear -> ReLU -> Linear)
# Row-tiled so it pipelines and stays within VMEM at real sizes.
# ----------------------------------------------------------------------------

def _pred_kernel(x_ref, ng_ref, nb_ref, w1_ref, b1_ref, w2_ref, b2_ref, o_ref):
    y = _ln(x_ref[...], ng_ref[...], nb_ref[...])
    h = jnp.dot(y.astype(jnp.bfloat16), w1_ref[...],
                preferred_element_type=jnp.float32) + b1_ref[...]
    h = jnp.maximum(h, 0.0)
    o_ref[...] = jnp.dot(h.astype(jnp.bfloat16), w2_ref[...],
                         preferred_element_type=jnp.float32) + b2_ref[...]


def pred_head(rows, ng, nb, w1, b1, w2, b2, row_tile=512):
    M, D = rows.shape
    H = w1.shape[1]
    N = w2.shape[1]
    tm = min(row_tile, M)
    return pl.pallas_call(
        _pred_kernel,
        out_shape=jax.ShapeDtypeStruct((M, N), jnp.float32),
        grid=(pl.cdiv(M, tm),),
        in_specs=[
            pl.BlockSpec((tm, D), lambda i: (i, 0)),
            _wspec((1, D), lambda i: (0, 0)),
            _wspec((1, D), lambda i: (0, 0)),
            _wspec((D, H), lambda i: (0, 0)),
            _wspec((1, H), lambda i: (0, 0)),
            _wspec((H, N), lambda i: (0, 0)),
            _wspec((1, N), lambda i: (0, 0)),
        ],
        out_specs=pl.BlockSpec((tm, N), lambda i: (i, 0)),
        compiler_params=pltpu.CompilerParams(
            dimension_semantics=("parallel",),
            vmem_limit_bytes=_VMEM_LIMIT),
    )(rows, ng, nb, w1, b1, w2, b2)


# ----------------------------------------------------------------------------
# Kernel: batched NCE statistics (replaces the per-sample Python loop)
#   total = enc @ pred.T ; softmax/argmax count ; sum(diag(log_softmax))
# ----------------------------------------------------------------------------

def _nce_kernel(enc_ref, pred_ref, o_ref):
    enc = enc_ref[0]                                             # (mp, 256) f32
    prd = pred_ref[0]                                            # (mp, 256) f32
    # bf16 MXU operands, f32 accumulate (tiny parity diff vs torch.mm f32)
    total = lax.dot_general(enc.astype(jnp.bfloat16), prd.astype(jnp.bfloat16),
                            (((1,), (1,)), ((), ())),
                            preferred_element_type=jnp.float32)  # (mp, mp)
    mp = total.shape[0]
    rows = lax.broadcasted_iota(jnp.int32, (mp, mp), 0)
    cols = lax.broadcasted_iota(jnp.int32, (mp, mp), 1)
    eye = (rows == cols).astype(jnp.float32)

    mx = jnp.max(total, axis=-1, keepdims=True)
    ex = jnp.exp(total - mx)
    ssum = jnp.sum(ex, axis=-1, keepdims=True)
    sm = ex / ssum                                               # softmax(dim=-1)
    colmax = jnp.max(sm, axis=0, keepdims=True)                  # (1, mp)
    # argmax(softmax, dim=0) == col index  <=>  diagonal attains the column max
    # TODO(synk): counts ties as correct, torch.argmax picks the first max index.
    correct_i = jnp.sum(eye * (sm >= colmax).astype(jnp.float32))
    lsm = (total - mx) - jnp.log(ssum)                           # log_softmax(dim=-1)
    nce_i = jnp.sum(eye * lsm)

    o_ref[0] = jnp.concatenate(
        [jnp.full((1, 128), correct_i, jnp.float32),
         jnp.full((1, 128), nce_i, jnp.float32)], axis=0)


# ----------------------------------------------------------------------------
# Kernel: MSE reduction (grid-accumulated; rows zero-padded to a full tile)
# ----------------------------------------------------------------------------

def _mse_kernel(a_ref, b_ref, o_ref):
    @pl.when(pl.program_id(0) == 0)
    def _():
        o_ref[...] = jnp.zeros_like(o_ref)
    d = a_ref[...] - b_ref[...]
    o_ref[...] += jnp.sum(d * d, axis=(0, 1), keepdims=True)


def mse(a, b, row_tile=1024):
    a2 = a.reshape(-1, a.shape[-1]).astype(jnp.float32)
    b2 = b.reshape(-1, b.shape[-1]).astype(jnp.float32)
    M, N = a2.shape
    tm = min(row_tile, M)
    pad = (-M) % tm
    if pad:  # zero-pad both operands: padded rows contribute 0 to the sum
        a2 = jnp.pad(a2, ((0, pad), (0, 0)))
        b2 = jnp.pad(b2, ((0, pad), (0, 0)))
    nt = (M + pad) // tm
    s = pl.pallas_call(
        _mse_kernel,
        out_shape=jax.ShapeDtypeStruct((1, 1), jnp.float32),
        grid=(nt,),
        in_specs=[
            pl.BlockSpec((tm, N), lambda i: (i, 0)),
            pl.BlockSpec((tm, N), lambda i: (i, 0)),
        ],
        out_specs=pl.BlockSpec((1, 1), lambda i: (0, 0)),
        compiler_params=pltpu.CompilerParams(
            dimension_semantics=("arbitrary",),
            vmem_limit_bytes=_VMEM_LIMIT),
    )(a2, b2)
    return s[0, 0] / (M * N)


# ----------------------------------------------------------------------------
# Model glue (reshapes, mask scatter, gathers, block wiring)
# ----------------------------------------------------------------------------

def patchify(x, cfg):
    """x: (B, input_tdim, input_fdim) -> (B, L, fshape*tshape).

    Equivalent to forward(): unsqueeze(1).transpose(2,3) then nn.Unfold
    (kernel == stride), same patch ordering as the Conv2d patch embed.
    """
    B = x.shape[0]
    F, T = cfg["input_fdim"], cfg["input_tdim"]
    fs, ts = cfg["fshape"], cfg["tshape"]
    pf, pt = F // fs, T // ts
    xt = jnp.transpose(x, (0, 2, 1))                       # (B, F, T)
    p = xt.reshape(B, pf, fs, pt, ts)
    p = p.transpose(0, 1, 3, 2, 4).reshape(B, pf * pt, fs * ts)
    return p.astype(jnp.float32)


def build_mask(mask_index, B, L):
    m = jnp.ones((B, L), jnp.float32)
    m = m.at[jnp.arange(B)[:, None], mask_index].set(0.0)
    return m[:, :, None]


def backbone(patches, mask_index, params, cfg):
    """patch-embed + masking + [cls,dist] + pos-embed + blocks (pre-final-norm)."""
    B, L, _ = patches.shape
    mask = build_mask(mask_index, B, L)
    tokens = embed_tokens(patches, mask, params, cfg)      # pos_drop p=0
    return transformer_blocks(tokens, params["blocks"], cfg["heads"], cfg["depth"])


def mpg_forward(x, mask_index, params, cfg):
    """'pretrain_mpg' task -> scalar MSE."""
    patches = patchify(x, cfg)
    feats = backbone(patches, mask_index, params, cfg)
    B, mp = mask_index.shape
    D = cfg["embed_dim"]
    rows = feats[jnp.arange(B)[:, None], mask_index + cfg["cls_token_num"]]
    rows = rows.reshape(B * mp, D)
    pred = pred_head(rows, params["norm_g"], params["norm_b"],
                     params["gpred1_w"], params["gpred1_b"],
                     params["gpred2_w"], params["gpred2_b"])
    target = patches[jnp.arange(B)[:, None], mask_index].reshape(B * mp, -1)
    return mse(pred, target)


def mpc_forward(x, mask_index, params, cfg):
    """'pretrain_mpc' task -> (acc, nce)."""
    patches = patchify(x, cfg)
    feats = backbone(patches, mask_index, params, cfg)
    B, mp = mask_index.shape
    D = cfg["embed_dim"]
    rows = feats[jnp.arange(B)[:, None], mask_index + cfg["cls_token_num"]]
    rows = rows.reshape(B * mp, D)
    pred = pred_head(rows, params["norm_g"], params["norm_b"],
                     params["cpred1_w"], params["cpred1_b"],
                     params["cpred2_w"], params["cpred2_b"]).reshape(B, mp, 256)
    enc = patches[jnp.arange(B)[:, None], mask_index]      # (B, mp, 256)
    stats = pl.pallas_call(
        _nce_kernel,
        out_shape=jax.ShapeDtypeStruct((B, 2, 128), jnp.float32),
        grid=(B,),
        in_specs=[
            pl.BlockSpec((1, mp, 256), lambda b: (b, 0, 0)),
            pl.BlockSpec((1, mp, 256), lambda b: (b, 0, 0)),
        ],
        out_specs=pl.BlockSpec((1, 2, 128), lambda b: (b, 0, 0)),
        compiler_params=pltpu.CompilerParams(
            dimension_semantics=("parallel",),
            vmem_limit_bytes=_VMEM_LIMIT),
    )(enc, pred)
    correct = jnp.sum(stats[:, 0, 0])
    nce = jnp.sum(stats[:, 1, 0])
    acc = correct / (B * mp)
    nce = nce / (-1.0 * B * mp)
    return acc, nce


# ----------------------------------------------------------------------------
# Deterministic parameter construction (synthetic init, no checkpoint load)
# Weights pre-cast to bf16 once; biases / LN params pre-reshaped to (1, N) f32.
# Per-layer weights stacked along a leading depth axis for the fused block call.
# ----------------------------------------------------------------------------

def init_params(key, cfg):
    D = cfg["embed_dim"]
    P = cfg["fshape"] * cfg["tshape"]
    L = cfg["num_patches"]
    Ntok = L + cfg["cls_token_num"]
    depth = cfg["depth"]
    heads = cfg["heads"]
    hidden = 4 * D
    dh = D // heads
    attn_scale = dh ** -0.5
    ks = iter(jax.random.split(key, 32))

    def wf32(shape, std=0.02):
        return std * jax.random.normal(next(ks), shape, jnp.float32)

    def w(shape, std=0.02):                       # bf16 MXU weights
        return wf32(shape, std).astype(jnp.bfloat16)

    # Fold the 1/sqrt(dh) attention scale into the q columns of qkv_w / qkv_b.
    qkv_w = wf32((depth, D, 3 * D))
    qkv_w = qkv_w.at[:, :, :D].multiply(attn_scale)
    qkv_b = jnp.zeros((depth, 1, 3 * D), jnp.float32)   # zeros, q-scale fold is a no-op

    params = {
        "patch_w": w((P, D)), "patch_b": jnp.zeros((1, D), jnp.float32),
        "cls_token": wf32((1, D)), "dist_token": wf32((1, D)),
        "pos_embed": wf32((1, Ntok, D)),
        "mask_embed": wf32((1, D), std=math.sqrt(2.0 / (1.0 + D))),
        "norm_g": jnp.ones((1, D), jnp.float32),
        "norm_b": jnp.zeros((1, D), jnp.float32),
        "gpred1_w": w((D, D)), "gpred1_b": jnp.zeros((1, D), jnp.float32),
        "gpred2_w": w((D, P)), "gpred2_b": jnp.zeros((1, P), jnp.float32),
        "cpred1_w": w((D, D)), "cpred1_b": jnp.zeros((1, D), jnp.float32),
        "cpred2_w": w((D, 256)), "cpred2_b": jnp.zeros((1, 256), jnp.float32),
        "blocks": {
            "n1_g": jnp.ones((depth, 1, D), jnp.float32),
            "n1_b": jnp.zeros((depth, 1, D), jnp.float32),
            "qkv_w": qkv_w.astype(jnp.bfloat16), "qkv_b": qkv_b,
            "proj_w": w((depth, D, D)),
            "proj_b": jnp.zeros((depth, 1, D), jnp.float32),
            "n2_g": jnp.ones((depth, 1, D), jnp.float32),
            "n2_b": jnp.zeros((depth, 1, D), jnp.float32),
            "fc1_w": w((depth, D, hidden)),
            "fc1_b": jnp.zeros((depth, 1, hidden), jnp.float32),
            "fc2_w": w((depth, hidden, D)),
            "fc2_b": jnp.zeros((depth, 1, D), jnp.float32),
        },
    }
    return params


# ----------------------------------------------------------------------------
# Main
# ----------------------------------------------------------------------------

if __name__ == "__main__":
    _BUFFERED_OK = _probe_buffered_support()

    # Small-scale, structure-faithful config: fshape*tshape == 256 so the
    # hard-coded 256-wide cpredlayer / encode_samples match the SSAST default
    # (fshape=128, tshape=2).
    # TODO(synk): real 'base' model uses embed_dim=768, depth=12, heads=12.
    cfg = dict(
        fshape=128, tshape=2, fstride=128, tstride=2,
        input_fdim=128, input_tdim=16,
        embed_dim=64, depth=2, heads=4, cls_token_num=2,
    )
    cfg["p_f_dim"] = cfg["input_fdim"] // cfg["fshape"]   # 1
    cfg["p_t_dim"] = cfg["input_tdim"] // cfg["tshape"]   # 8
    cfg["num_patches"] = cfg["p_f_dim"] * cfg["p_t_dim"]  # 8
    B = 2
    mask_patch = 4

    x = jax.random.normal(jax.random.PRNGKey(0),
                          (B, cfg["input_tdim"], cfg["input_fdim"]),
                          dtype=jnp.float32)
    params = init_params(jax.random.PRNGKey(42), cfg)

    # TODO(synk): gen_maskid_patch/gen_maskid_frame use Python `random`; replaced
    # with deterministic distinct indices per batch element.
    mask_index = jnp.stack([
        jax.random.choice(jax.random.fold_in(jax.random.PRNGKey(7), i),
                          cfg["num_patches"], (mask_patch,), replace=False)
        for i in range(B)
    ]).astype(jnp.int32)

    mpg_jit = jax.jit(lambda xs, mi: mpg_forward(xs, mi, params, cfg))
    mpc_jit = jax.jit(lambda xs, mi: mpc_forward(xs, mi, params, cfg))

    # task == 'pretrain_mpg'
    mse_val = mpg_jit(x, mask_index)
    # task == 'pretrain_mpc'   (TODO(synk): 'visualize_mask' fold path not implemented)
    acc, nce = mpc_jit(x, mask_index)

    jax.block_until_ready((mse_val, acc, nce))
    print("KERNEL_OK")
</pallas_src>

<mosaic_0001>
module attributes {stable_mosaic.version = 11 : i64} {
  func.func @k(%arg0: i32, %arg1: memref<8x128xf32, #tpu.memory_space<vmem>>, %arg2: memref<8x128xf32, #tpu.memory_space<vmem>>, %arg3: memref<8x128xf32, #tpu.memory_space<vmem>>) attributes {dimension_semantics = [#tpu.dimension_semantics<arbitrary>], iteration_bounds = array<i64: 2>, scalar_prefetch = 0 : i64, scratch_operands = 0 : i64, tpu.core_type = #tpu.core_type<tc>, window_params = [{pipeline_mode = #tpu.pipeline_mode<synchronous>, transform_indices = @transform_0, window_bounds = array<i64: 8, 128>}, {transform_indices = @transform_1, window_bounds = array<i64: 8, 128>}, {transform_indices = @transform_2, window_bounds = array<i64: 8, 128>}]} {
    %c0 = arith.constant 0 : index
    %c0_0 = arith.constant 0 : index
    %0 = vector.load %arg2[%c0, %c0_0] : memref<8x128xf32, #tpu.memory_space<vmem>>, vector<8x128xf32>
    %c0_1 = arith.constant 0 : index
    %c0_2 = arith.constant 0 : index
    %1 = vector.load %arg1[%c0_1, %c0_2] : memref<8x128xf32, #tpu.memory_space<vmem>>, vector<8x128xf32>
    %2 = arith.addf %0, %1 : vector<8x128xf32>
    %c0_3 = arith.constant 0 : index
    %c0_4 = arith.constant 0 : index
    %3 = vector.load %arg3[%c0_3, %c0_4] : memref<8x128xf32, #tpu.memory_space<vmem>>, vector<8x128xf32>
    tpu.vector_store %arg3[%c0_3, %c0_4], %2 {strides = array<i32>} : memref<8x128xf32, #tpu.memory_space<vmem>>, vector<8x128xf32>,
    return
  }
  func.func @transform_0(%arg0: i32) -> (i32, i32) {
    %c0_i32 = arith.constant 0 : i32
    %c0_i32_0 = arith.constant 0 : i32
    %c0_i32_1 = arith.constant 0 : i32
    return %c0_i32, %c0_i32_0 : i32, i32
  }
  func.func @transform_1(%arg0: i32) -> (i32, i32) {
    %c0_i32 = arith.constant 0 : i32
    %c0_i32_0 = arith.constant 0 : i32
    return %arg0, %c0_i32 : i32, i32
  }
  func.func @transform_2(%arg0: i32) -> (i32, i32) {
    %c0_i32 = arith.constant 0 : i32
    %c0_i32_0 = arith.constant 0 : i32
    return %arg0, %c0_i32 : i32, i32
  }
}

module attributes {stable_mosaic.version = 11 : i64} {
  func.func @_embed_kernel(%arg0: i32, %arg1: memref<1x8x256xf32, #tpu.memory_space<vmem>>, %arg2: memref<1x8x1xf32, #tpu.memory_space<vmem>>, %arg3: memref<256x64xbf16, #tpu.memory_space<vmem>>, %arg4: memref<1x64xf32, #tpu.memory_space<vmem>>, %arg5: memref<1x64xf32, #tpu.memory_space<vmem>>, %arg6: memref<1x64xf32, #tpu.memory_space<vmem>>, %arg7: memref<1x64xf32, #tpu.memory_space<vmem>>, %arg8: memref<1x10x64xf32, #tpu.memory_space<vmem>>, %arg9: memref<1x10x64xf32, #tpu.memory_space<vmem>>) attributes {dimension_semantics = [#tpu.dimension_semantics<parallel>], iteration_bounds = array<i64: 2>, scalar_prefetch = 0 : i64, scratch_operands = 0 : i64, tpu.core_type = #tpu.core_type<tc>, window_params = [{transform_indices = @transform_0, window_bounds = array<i64: 1, 8, 256>}, {transform_indices = @transform_1, window_bounds = array<i64: 1, 8, 1>}, {pipeline_mode = #tpu.pipeline_mode<synchronous>, transform_indices = @transform_2, window_bounds = array<i64: 256, 64>}, {pipeline_mode = #tpu.pipeline_mode<synchronous>, transform_indices = @transform_3, window_bounds = array<i64: 1, 64>}, {pipeline_mode = #tpu.pipeline_mode<synchronous>, transform_indices = @transform_4, window_bounds = array<i64: 1, 64>}, {pipeline_mode = #tpu.pipeline_mode<synchronous>, transform_indices = @transform_5, window_bounds = array<i64: 1, 64>}, {pipeline_mode = #tpu.pipeline_mode<synchronous>, transform_indices = @transform_6, window_bounds = array<i64: 1, 64>}, {pipeline_mode = #tpu.pipeline_mode<synchronous>, transform_indices = @transform_7, window_bounds = array<i64: 1, 10, 64>}, {transform_indices = @transform_8, window_bounds = array<i64: 1, 10, 64>}]} {
    %c0 = arith.constant 0 : index
    %c0_0 = arith.constant 0 : index
    %c0_1 = arith.constant 0 : index
    %0 = vector.load %arg1[%c0, %c0_0, %c0_1] : memref<1x8x256xf32, #tpu.memory_space<vmem>>, vector<1x8x256xf32>
    %1 = vector.shape_cast %0 : vector<1x8x256xf32> to vector<8x256xf32>
    %2 = arith.truncf %1 : vector<8x256xf32> to vector<8x256xbf16>
    %c0_2 = arith.constant 0 : index
    %c0_3 = arith.constant 0 : index
    %3 = vector.load %arg3[%c0_2, %c0_3] : memref<256x64xbf16, #tpu.memory_space<vmem>>, vector<256x64xbf16>
    %cst = arith.constant dense<0.000000e+00> : vector<8x64xf32>
    %4 = tpu.matmul %2, %3, %cst {dimension_numbers = #tpu.dot_dimension_numbers<[1], [0], [0], [1], [0, 0, 1, 1], [], []>} : vector<8x256xbf16>, vector<256x64xbf16>, vector<8x64xf32> -> vector<8x64xf32>
    %c0_4 = arith.constant 0 : index
    %c0_5 = arith.constant 0 : index
    %5 = vector.load %arg4[%c0_4, %c0_5] : memref<1x64xf32, #tpu.memory_space<vmem>>, vector<1x64xf32>
    %6 = vector.broadcast %5 : vector<1x64xf32> to vector<8x64xf32>
    %7 = arith.addf %4, %6 : vector<8x64xf32>
    %c0_6 = arith.constant 0 : index
    %c0_7 = arith.constant 0 : index
    %c0_8 = arith.constant 0 : index
    %8 = vector.load %arg2[%c0_6, %c0_7, %c0_8] : memref<1x8x1xf32, #tpu.memory_space<vmem>>, vector<1x8x1xf32>
    %9 = vector.shape_cast %8 : vector<1x8x1xf32> to vector<8x1xf32>
    %10 = vector.broadcast %9 : vector<8x1xf32> to vector<8x64xf32>
    %11 = arith.mulf %7, %10 : vector<8x64xf32>
    %cst_9 = arith.constant 1.000000e+00 : f32
    %12 = vector.broadcast %cst_9 : f32 to vector<8x1xf32>
    %13 = arith.subf %12, %9 : vector<8x1xf32>
    %c0_10 = arith.constant 0 : index
    %c0_11 = arith.constant 0 : index
    %14 = vector.load %arg7[%c0_10, %c0_11] : memref<1x64xf32, #tpu.memory_space<vmem>>, vector<1x64xf32>
    %15 = vector.broadcast %13 : vector<8x1xf32> to vector<8x64xf32>
    %16 = vector.broadcast %14 : vector<1x64xf32> to vector<8x64xf32>
    %17 = arith.mulf %15, %16 : vector<8x64xf32>
    %18 = arith.addf %11, %17 : vector<8x64xf32>
    %c0_12 = arith.constant 0 : index
    %c0_13 = arith.constant 0 : index
    %19 = vector.load %arg5[%c0_12, %c0_13] : memref<1x64xf32, #tpu.memory_space<vmem>>, vector<1x64xf32>
    %c0_14 = arith.constant 0 : index
    %c0_15 = arith.constant 0 : index
    %20 = vector.load %arg6[%c0_14, %c0_15] : memref<1x64xf32, #tpu.memory_space<vmem>>, vector<1x64xf32>
    %21 = tpu.concatenate %19, %20, %18 in 0 : vector<1x64xf32>, vector<1x64xf32>, vector<8x64xf32> -> vector<10x64xf32>
    %c0_16 = arith.constant 0 : index
    %c0_17 = arith.constant 0 : index
    %c0_18 = arith.constant 0 : index
    %22 = vector.load %arg8[%c0_16, %c0_17, %c0_18] : memref<1x10x64xf32, #tpu.memory_space<vmem>>, vector<1x10x64xf32>
    %23 = vector.shape_cast %22 : vector<1x10x64xf32> to vector<10x64xf32>
    %24 = arith.addf %21, %23 : vector<10x64xf32>
    %c0_19 = arith.constant 0 : index
    %c0_20 = arith.constant 0 : index
    %c0_21 = arith.constant 0 : index
    %25 = vector.load %arg9[%c0_19, %c0_20, %c0_21] : memref<1x10x64xf32, #tpu.memory_space<vmem>>, vector<1x10x64xf32>
    %26 = vector.shape_cast %25 : vector<1x10x64xf32> to vector<10x64xf32>
    %27 = vector.shape_cast %24 : vector<10x64xf32> to vector<1x10x64xf32>
    tpu.vector_store %arg9[%c0_19, %c0_20, %c0_21], %27 {strides = array<i32>} : memref<1x10x64xf32, #tpu.memory_space<vmem>>, vector<1x10x64xf32>,
    return
  }
  func.func @transform_0(%arg0: i32) -> (i32, i32, i32) {
    %c0_i32 = arith.constant 0 : i32
    %c0_i32_0 = arith.constant 0 : i32
    %c0_i32_1 = arith.constant 0 : i32
    return %arg0, %c0_i32, %c0_i32_0 : i32, i32, i32
  }
  func.func @transform_1(%arg0: i32) -> (i32, i32, i32) {
    %c0_i32 = arith.constant 0 : i32
    %c0_i32_0 = arith.constant 0 : i32
    %c0_i32_1 = arith.constant 0 : i32
    return %arg0, %c0_i32, %c0_i32_0 : i32, i32, i32
  }
  func.func @transform_2(%arg0: i32) -> (i32, i32) {
    %c0_i32 = arith.constant 0 : i32
    %c0_i32_0 = arith.constant 0 : i32
    %c0_i32_1 = arith.constant 0 : i32
    return %c0_i32, %c0_i32_0 : i32, i32
  }
  func.func @transform_3(%arg0: i32) -> (i32, i32) {
    %c0_i32 = arith.constant 0 : i32
    %c0_i32_0 = arith.constant 0 : i32
    %c0_i32_1 = arith.constant 0 : i32
    return %c0_i32, %c0_i32_0 : i32, i32
  }
  func.func @transform_4(%arg0: i32) -> (i32, i32) {
    %c0_i32 = arith.constant 0 : i32
    %c0_i32_0 = arith.constant 0 : i32
    %c0_i32_1 = arith.constant 0 : i32
    return %c0_i32, %c0_i32_0 : i32, i32
  }
  func.func @transform_5(%arg0: i32) -> (i32, i32) {
    %c0_i32 = arith.constant 0 : i32
    %c0_i32_0 = arith.constant 0 : i32
    %c0_i32_1 = arith.constant 0 : i32
    return %c0_i32, %c0_i32_0 : i32, i32
  }
  func.func @transform_6(%arg0: i32) -> (i32, i32) {
    %c0_i32 = arith.constant 0 : i32
    %c0_i32_0 = arith.constant 0 : i32
    %c0_i32_1 = arith.constant 0 : i32
    return %c0_i32, %c0_i32_0 : i32, i32
  }
  func.func @transform_7(%arg0: i32) -> (i32, i32, i32) {
    %c0_i32 = arith.constant 0 : i32
    %c0_i32_0 = arith.constant 0 : i32
    %c0_i32_1 = arith.constant 0 : i32
    %c0_i32_2 = arith.constant 0 : i32
    return %c0_i32, %c0_i32_0, %c0_i32_1 : i32, i32, i32
  }
  func.func @transform_8(%arg0: i32) -> (i32, i32, i32) {
    %c0_i32 = arith.constant 0 : i32
    %c0_i32_0 = arith.constant 0 : i32
    %c0_i32_1 = arith.constant 0 : i32
    return %arg0, %c0_i32, %c0_i32_0 : i32, i32, i32
  }
}

module attributes {stable_mosaic.version = 11 : i64} {
  func.func @_pred_kernel(%arg0: i32, %arg1: memref<8x64xf32, #tpu.memory_space<vmem>>, %arg2: memref<1x64xf32, #tpu.memory_space<vmem>>, %arg3: memref<1x64xf32, #tpu.memory_space<vmem>>, %arg4: memref<64x64xbf16, #tpu.memory_space<vmem>>, %arg5: memref<1x64xf32, #tpu.memory_space<vmem>>, %arg6: memref<64x256xbf16, #tpu.memory_space<vmem>>, %arg7: memref<1x256xf32, #tpu.memory_space<vmem>>, %arg8: memref<8x256xf32, #tpu.memory_space<vmem>>) attributes {dimension_semantics = [#tpu.dimension_semantics<parallel>], iteration_bounds = array<i64: 1>, scalar_prefetch = 0 : i64, scratch_operands = 0 : i64, tpu.core_type = #tpu.core_type<tc>, window_params = [{transform_indices = @transform_0, window_bounds = array<i64: 8, 64>}, {pipeline_mode = #tpu.pipeline_mode<synchronous>, transform_indices = @transform_1, window_bounds = array<i64: 1, 64>}, {pipeline_mode = #tpu.pipeline_mode<synchronous>, transform_indices = @transform_2, window_bounds = array<i64: 1, 64>}, {pipeline_mode = #tpu.pipeline_mode<synchronous>, transform_indices = @transform_3, window_bounds = array<i64: 64, 64>}, {pipeline_mode = #tpu.pipeline_mode<synchronous>, transform_indices = @transform_4, window_bounds = array<i64: 1, 64>}, {pipeline_mode = #tpu.pipeline_mode<synchronous>, transform_indices = @transform_5, window_bounds = array<i64: 64, 256>}, {pipeline_mode = #tpu.pipeline_mode<synchronous>, transform_indices = @transform_6, window_bounds = array<i64: 1, 256>}, {transform_indices = @transform_7, window_bounds = array<i64: 8, 256>}]} {
    %c0 = arith.constant 0 : index
    %c0_0 = arith.constant 0 : index
    %0 = vector.load %arg1[%c0, %c0_0] : memref<8x64xf32, #tpu.memory_space<vmem>>, vector<8x64xf32>
    %c0_1 = arith.constant 0 : index
    %c0_2 = arith.constant 0 : index
    %1 = vector.load %arg2[%c0_1, %c0_2] : memref<1x64xf32, #tpu.memory_space<vmem>>, vector<1x64xf32>
    %c0_3 = arith.constant 0 : index
    %c0_4 = arith.constant 0 : index
    %2 = vector.load %arg3[%c0_3, %c0_4] : memref<1x64xf32, #tpu.memory_space<vmem>>, vector<1x64xf32>
    %cst = arith.constant dense<0.000000e+00> : vector<8xf32>
    %3 = vector.multi_reduction <add>, %0, %cst [1] : vector<8x64xf32> to vector<8xf32>
    %4 = vector.shape_cast %3 : vector<8xf32> to vector<8x1xf32>
    %cst_5 = arith.constant 6.400000e+01 : f32
    %5 = vector.broadcast %cst_5 : f32 to vector<8x1xf32>
    %6 = arith.divf %4, %5 : vector<8x1xf32>
    %7 = vector.broadcast %6 : vector<8x1xf32> to vector<8x64xf32>
    %8 = arith.subf %0, %7 : vector<8x64xf32>
    %9 = arith.mulf %8, %8 : vector<8x64xf32>
    %cst_6 = arith.constant dense<0.000000e+00> : vector<8xf32>
    %10 = vector.multi_reduction <add>, %9, %cst_6 [1] : vector<8x64xf32> to vector<8xf32>
    %11 = vector.shape_cast %10 : vector<8xf32> to vector<8x1xf32>
    %cst_7 = arith.constant 6.400000e+01 : f32
    %12 = vector.broadcast %cst_7 : f32 to vector<8x1xf32>
    %13 = arith.divf %11, %12 : vector<8x1xf32>
    %cst_8 = arith.constant 9.99999997E-7 : f32
    %14 = vector.broadcast %cst_8 : f32 to vector<8x1xf32>
    %15 = arith.addf %13, %14 : vector<8x1xf32>
    %16 = math.rsqrt %15 : vector<8x1xf32>
    %17 = vector.broadcast %16 : vector<8x1xf32> to vector<8x64xf32>
    %18 = arith.mulf %8, %17 : vector<8x64xf32>
    %19 = vector.broadcast %1 : vector<1x64xf32> to vector<8x64xf32>
    %20 = arith.mulf %18, %19 : vector<8x64xf32>
    %21 = vector.broadcast %2 : vector<1x64xf32> to vector<8x64xf32>
    %22 = arith.addf %20, %21 : vector<8x64xf32>
    %23 = arith.truncf %22 : vector<8x64xf32> to vector<8x64xbf16>
    %c0_9 = arith.constant 0 : index
    %c0_10 = arith.constant 0 : index
    %24 = vector.load %arg4[%c0_9, %c0_10] : memref<64x64xbf16, #tpu.memory_space<vmem>>, vector<64x64xbf16>
    %cst_11 = arith.constant dense<0.000000e+00> : vector<8x64xf32>
    %25 = tpu.matmul %23, %24, %cst_11 {dimension_numbers = #tpu.dot_dimension_numbers<[1], [0], [0], [1], [0, 0, 1, 1], [], []>} : vector<8x64xbf16>, vector<64x64xbf16>, vector<8x64xf32> -> vector<8x64xf32>
    %c0_12 = arith.constant 0 : index
    %c0_13 = arith.constant 0 : index
    %26 = vector.load %arg5[%c0_12, %c0_13] : memref<1x64xf32, #tpu.memory_space<vmem>>, vector<1x64xf32>
    %27 = vector.broadcast %26 : vector<1x64xf32> to vector<8x64xf32>
    %28 = arith.addf %25, %27 : vector<8x64xf32>
    %cst_14 = arith.constant 0.000000e+00 : f32
    %29 = vector.broadcast %cst_14 : f32 to vector<8x64xf32>
    %30 = arith.maximumf %28, %29 : vector<8x64xf32>
    %31 = arith.truncf %30 : vector<8x64xf32> to vector<8x64xbf16>
    %c0_15 = arith.constant 0 : index
    %c0_16 = arith.constant 0 : index
    %32 = vector.load %arg6[%c0_15, %c0_16] : memref<64x256xbf16, #tpu.memory_space<vmem>>, vector<64x256xbf16>
    %cst_17 = arith.constant dense<0.000000e+00> : vector<8x256xf32>
    %33 = tpu.matmul %31, %32, %cst_17 {dimension_numbers = #tpu.dot_dimension_numbers<[1], [0], [0], [1], [0, 0, 1, 1], [], []>} : vector<8x64xbf16>, vector<64x256xbf16>, vector<8x256xf32> -> vector<8x256xf32>
    %c0_18 = arith.constant 0 : index
    %c0_19 = arith.constant 0 : index
    %34 = vector.load %arg7[%c0_18, %c0_19] : memref<1x256xf32, #tpu.memory_space<vmem>>, vector<1x256xf32>
    %35 = vector.broadcast %34 : vector<1x256xf32> to vector<8x256xf32>
    %36 = arith.addf %33, %35 : vector<8x256xf32>
    %c0_20 = arith.constant 0 : index
    %c0_21 = arith.constant 0 : index
    %37 = vector.load %arg8[%c0_20, %c0_21] : memref<8x256xf32, #tpu.memory_space<vmem>>, vector<8x256xf32>
    tpu.vector_store %arg8[%c0_20, %c0_21], %36 {strides = array<i32>} : memref<8x256xf32, #tpu.memory_space<vmem>>, vector<8x256xf32>,
    return
  }
  func.func @transform_0(%arg0: i32) -> (i32, i32) {
    %c0_i32 = arith.constant 0 : i32
    %c0_i32_0 = arith.constant 0 : i32
    return %arg0, %c0_i32 : i32, i32
  }
  func.func @transform_1(%arg0: i32) -> (i32, i32) {
    %c0_i32 = arith.constant 0 : i32
    %c0_i32_0 = arith.constant 0 : i32
    %c0_i32_1 = arith.constant 0 : i32
    return %c0_i32, %c0_i32_0 : i32, i32
  }
  func.func @transform_2(%arg0: i32) -> (i32, i32) {
    %c0_i32 = arith.constant 0 : i32
    %c0_i32_0 = arith.constant 0 : i32
    %c0_i32_1 = arith.constant 0 : i32
    return %c0_i32, %c0_i32_0 : i32, i32
  }
  func.func @transform_3(%arg0: i32) -> (i32, i32) {
    %c0_i32 = arith.constant 0 : i32
    %c0_i32_0 = arith.constant 0 : i32
    %c0_i32_1 = arith.constant 0 : i32
    return %c0_i32, %c0_i32_0 : i32, i32
  }
  func.func @transform_4(%arg0: i32) -> (i32, i32) {
    %c0_i32 = arith.constant 0 : i32
    %c0_i32_0 = arith.constant 0 : i32
    %c0_i32_1 = arith.constant 0 : i32
    return %c0_i32, %c0_i32_0 : i32, i32
  }
  func.func @transform_5(%arg0: i32) -> (i32, i32) {
    %c0_i32 = arith.constant 0 : i32
    %c0_i32_0 = arith.constant 0 : i32
    %c0_i32_1 = arith.constant 0 : i32
    return %c0_i32, %c0_i32_0 : i32, i32
  }
  func.func @transform_6(%arg0: i32) -> (i32, i32) {
    %c0_i32 = arith.constant 0 : i32
    %c0_i32_0 = arith.constant 0 : i32
    %c0_i32_1 = arith.constant 0 : i32
    return %c0_i32, %c0_i32_0 : i32, i32
  }
  func.func @transform_7(%arg0: i32) -> (i32, i32) {
    %c0_i32 = arith.constant 0 : i32
    %c0_i32_0 = arith.constant 0 : i32
    return %arg0, %c0_i32 : i32, i32
  }
}

module attributes {stable_mosaic.version = 11 : i64} {
  func.func @_blocks_kernel(%arg0: i32, %arg1: i32, %arg2: memref<1x10x64xf32, #tpu.memory_space<vmem>>, %arg3: memref<1x1x64xf32, #tpu.memory_space<vmem>>, %arg4: memref<1x1x64xf32, #tpu.memory_space<vmem>>, %arg5: memref<1x64x192xbf16, #tpu.memory_space<vmem>>, %arg6: memref<1x1x192xf32, #tpu.memory_space<vmem>>, %arg7: memref<1x64x64xbf16, #tpu.memory_space<vmem>>, %arg8: memref<1x1x64xf32, #tpu.memory_space<vmem>>, %arg9: memref<1x1x64xf32, #tpu.memory_space<vmem>>, %arg10: memref<1x1x64xf32, #tpu.memory_space<vmem>>, %arg11: memref<1x64x256xbf16, #tpu.memory_space<vmem>>, %arg12: memref<1x1x256xf32, #tpu.memory_space<vmem>>, %arg13: memref<1x256x64xbf16, #tpu.memory_space<vmem>>, %arg14: memref<1x1x64xf32, #tpu.memory_space<vmem>>, %arg15: memref<1x10x64xf32, #tpu.memory_space<vmem>>) attributes {dimension_semantics = [#tpu.dimension_semantics<parallel>, #tpu.dimension_semantics<arbitrary>], iteration_bounds = array<i64: 2, 2>, scalar_prefetch = 0 : i64, scratch_operands = 0 : i64, tpu.core_type = #tpu.core_type<tc>, window_params = [{transform_indices = @transform_0, window_bounds = array<i64: 1, 10, 64>}, {transform_indices = @transform_1, window_bounds = array<i64: 1, 1, 64>}, {transform_indices = @transform_2, window_bounds = array<i64: 1, 1, 64>}, {transform_indices = @transform_3, window_bounds = array<i64: 1, 64, 192>}, {transform_indices = @transform_4, window_bounds = array<i64: 1, 1, 192>}, {transform_indices = @transform_5, window_bounds = array<i64: 1, 64, 64>}, {transform_indices = @transform_6, window_bounds = array<i64: 1, 1, 64>}, {transform_indices = @transform_7, window_bounds = array<i64: 1, 1, 64>}, {transform_indices = @transform_8, window_bounds = array<i64: 1, 1, 64>}, {transform_indices = @transform_9, window_bounds = array<i64: 1, 64, 256>}, {transform_indices = @transform_10, window_bounds = array<i64: 1, 1, 256>}, {transform_indices = @transform_11, window_bounds = array<i64: 1, 256, 64>}, {transform_indices = @transform_12, window_bounds = array<i64: 1, 1, 64>}, {transform_indices = @transform_13, window_bounds = array<i64: 1, 10, 64>}]} {
    %c0_i32 = arith.constant 0 : i32
    %0 = arith.cmpi eq, %arg1, %c0_i32 : i32
    %1 = arith.extui %0 : i1 to i32
    %c0_i32_0 = arith.constant 0 : i32
    %2 = arith.cmpi ne, %1, %c0_i32_0 : i32
    scf.if %2 {
      %c0_75 = arith.constant 0 : index
      %c0_76 = arith.constant 0 : index
      %c0_77 = arith.constant 0 : index
      %180 = vector.load %arg2[%c0_75, %c0_76, %c0_77] : memref<1x10x64xf32, #tpu.memory_space<vmem>>, vector<1x10x64xf32>
      %181 = vector.shape_cast %180 : vector<1x10x64xf32> to vector<10x64xf32>
      %c0_78 = arith.constant 0 : index
      %c0_79 = arith.constant 0 : index
      %c0_80 = arith.constant 0 : index
      %182 = vector.load %arg15[%c0_78, %c0_79, %c0_80] : memref<1x10x64xf32, #tpu.memory_space<vmem>>, vector<1x10x64xf32>
      %183 = vector.shape_cast %182 : vector<1x10x64xf32> to vector<10x64xf32>
      %184 = vector.shape_cast %181 : vector<10x64xf32> to vector<1x10x64xf32>
      tpu.vector_store %arg15[%c0_78, %c0_79, %c0_80], %184 {strides = array<i32>} : memref<1x10x64xf32, #tpu.memory_space<vmem>>, vector<1x10x64xf32>,
    } else {
    }
    %c0 = arith.constant 0 : index
    %c0_1 = arith.constant 0 : index
    %c0_2 = arith.constant 0 : index
    %3 = vector.load %arg15[%c0, %c0_1, %c0_2] : memref<1x10x64xf32, #tpu.memory_space<vmem>>, vector<1x10x64xf32>
    %4 = vector.shape_cast %3 : vector<1x10x64xf32> to vector<10x64xf32>
    %c0_3 = arith.constant 0 : index
    %c0_4 = arith.constant 0 : index
    %c0_5 = arith.constant 0 : index
    %5 = vector.load %arg3[%c0_3, %c0_4, %c0_5] : memref<1x1x64xf32, #tpu.memory_space<vmem>>, vector<1x1x64xf32>
    %6 = vector.shape_cast %5 : vector<1x1x64xf32> to vector<1x64xf32>
    %c0_6 = arith.constant 0 : index
    %c0_7 = arith.constant 0 : index
    %c0_8 = arith.constant 0 : index
    %7 = vector.load %arg4[%c0_6, %c0_7, %c0_8] : memref<1x1x64xf32, #tpu.memory_space<vmem>>, vector<1x1x64xf32>
    %8 = vector.shape_cast %7 : vector<1x1x64xf32> to vector<1x64xf32>
    %cst = arith.constant dense<0.000000e+00> : vector<10xf32>
    %9 = vector.multi_reduction <add>, %4, %cst [1] : vector<10x64xf32> to vector<10xf32>
    %10 = vector.shape_cast %9 : vector<10xf32> to vector<10x1xf32>
    %cst_9 = arith.constant 6.400000e+01 : f32
    %11 = vector.broadcast %cst_9 : f32 to vector<10x1xf32>
    %12 = arith.divf %10, %11 : vector<10x1xf32>
    %13 = vector.broadcast %12 : vector<10x1xf32> to vector<10x64xf32>
    %14 = arith.subf %4, %13 : vector<10x64xf32>
    %15 = arith.mulf %14, %14 : vector<10x64xf32>
    %cst_10 = arith.constant dense<0.000000e+00> : vector<10xf32>
    %16 = vector.multi_reduction <add>, %15, %cst_10 [1] : vector<10x64xf32> to vector<10xf32>
    %17 = vector.shape_cast %16 : vector<10xf32> to vector<10x1xf32>
    %cst_11 = arith.constant 6.400000e+01 : f32
    %18 = vector.broadcast %cst_11 : f32 to vector<10x1xf32>
    %19 = arith.divf %17, %18 : vector<10x1xf32>
    %cst_12 = arith.constant 9.99999997E-7 : f32
    %20 = vector.broadcast %cst_12 : f32 to vector<10x1xf32>
    %21 = arith.addf %19, %20 : vector<10x1xf32>
    %22 = math.rsqrt %21 : vector<10x1xf32>
    %23 = vector.broadcast %22 : vector<10x1xf32> to vector<10x64xf32>
    %24 = arith.mulf %14, %23 : vector<10x64xf32>
    %25 = vector.broadcast %6 : vector<1x64xf32> to vector<10x64xf32>
    %26 = arith.mulf %24, %25 : vector<10x64xf32>
    %27 = vector.broadcast %8 : vector<1x64xf32> to vector<10x64xf32>
    %28 = arith.addf %26, %27 : vector<10x64xf32>
    %29 = arith.truncf %28 : vector<10x64xf32> to vector<10x64xbf16>
    %c0_13 = arith.constant 0 : index
    %c0_14 = arith.constant 0 : index
    %c0_15 = arith.constant 0 : index
    %30 = vector.load %arg5[%c0_13, %c0_14, %c0_15] : memref<1x64x192xbf16, #tpu.memory_space<vmem>>, vector<1x64x192xbf16>
    %31 = vector.shape_cast %30 : vector<1x64x192xbf16> to vector<64x192xbf16>
    %cst_16 = arith.constant dense<0.000000e+00> : vector<10x192xf32>
    %32 = tpu.matmul %29, %31, %cst_16 {dimension_numbers = #tpu.dot_dimension_numbers<[1], [0], [0], [1], [0, 0, 1, 1], [], []>} : vector<10x64xbf16>, vector<64x192xbf16>, vector<10x192xf32> -> vector<10x192xf32>
    %c0_17 = arith.constant 0 : index
    %c0_18 = arith.constant 0 : index
    %c0_19 = arith.constant 0 : index
    %33 = vector.load %arg6[%c0_17, %c0_18, %c0_19] : memref<1x1x192xf32, #tpu.memory_space<vmem>>, vector<1x1x192xf32>
    %34 = vector.shape_cast %33 : vector<1x1x192xf32> to vector<1x192xf32>
    %35 = vector.broadcast %34 : vector<1x192xf32> to vector<10x192xf32>
    %36 = arith.addf %32, %35 : vector<10x192xf32>
    %37 = vector.extract_strided_slice %36 {offsets = [0, 0], sizes = [10, 16], strides = [1, 1]} : vector<10x192xf32> to vector<10x16xf32>
    %38 = arith.truncf %37 : vector<10x16xf32> to vector<10x16xbf16>
    %39 = vector.extract_strided_slice %36 {offsets = [0, 64], sizes = [10, 16], strides = [1, 1]} : vector<10x192xf32> to vector<10x16xf32>
    %40 = arith.truncf %39 : vector<10x16xf32> to vector<10x16xbf16>
    %41 = vector.extract_strided_slice %36 {offsets = [0, 128], sizes = [10, 16], strides = [1, 1]} : vector<10x192xf32> to vector<10x16xf32>
    %42 = arith.truncf %41 : vector<10x16xf32> to vector<10x16xbf16>
    %cst_20 = arith.constant dense<0.000000e+00> : vector<10x10xf32>
    %43 = tpu.matmul %38, %40, %cst_20 {dimension_numbers = #tpu.dot_dimension_numbers<[1], [1], [0], [0], [0, 0, 1, 0], [], []>} : vector<10x16xbf16>, vector<10x16xbf16>, vector<10x10xf32> -> vector<10x10xf32>
    %cst_21 = arith.constant dense<0xFF800000> : vector<10xf32>
    %44 = vector.multi_reduction <maximumf>, %43, %cst_21 [1] : vector<10x10xf32> to vector<10xf32>
    %45 = vector.shape_cast %44 : vector<10xf32> to vector<10x1xf32>
    %46 = vector.broadcast %45 : vector<10x1xf32> to vector<10x10xf32>
    %47 = arith.subf %43, %46 : vector<10x10xf32>
    %48 = math.exp %47 : vector<10x10xf32>
    %cst_22 = arith.constant dense<0.000000e+00> : vector<10xf32>
    %49 = vector.multi_reduction <add>, %48, %cst_22 [1] : vector<10x10xf32> to vector<10xf32>
    %50 = vector.shape_cast %49 : vector<10xf32> to vector<10x1xf32>
    %51 = tpu.reciprocal %50 {approx = true} : vector<10x1xf32> -> vector<10x1xf32>
    %52 = vector.broadcast %51 : vector<10x1xf32> to vector<10x10xf32>
    %53 = arith.mulf %48, %52 : vector<10x10xf32>
    %54 = arith.truncf %53 : vector<10x10xf32> to vector<10x10xbf16>
    %cst_23 = arith.constant dense<0.000000e+00> : vector<10x16xf32>
    %55 = tpu.matmul %54, %42, %cst_23 {dimension_numbers = #tpu.dot_dimension_numbers<[1], [0], [0], [1], [0, 0, 1, 1], [], []>} : vector<10x10xbf16>, vector<10x16xbf16>, vector<10x16xf32> -> vector<10x16xf32>
    %56 = vector.extract_strided_slice %36 {offsets = [0, 16], sizes = [10, 16], strides = [1, 1]} : vector<10x192xf32> to vector<10x16xf32>
    %57 = arith.truncf %56 : vector<10x16xf32> to vector<10x16xbf16>
    %58 = vector.extract_strided_slice %36 {offsets = [0, 80], sizes = [10, 16], strides = [1, 1]} : vector<10x192xf32> to vector<10x16xf32>
    %59 = arith.truncf %58 : vector<10x16xf32> to vector<10x16xbf16>
    %60 = vector.extract_strided_slice %36 {offsets = [0, 144], sizes = [10, 16], strides = [1, 1]} : vector<10x192xf32> to vector<10x16xf32>
    %61 = arith.truncf %60 : vector<10x16xf32> to vector<10x16xbf16>
    %cst_24 = arith.constant dense<0.000000e+00> : vector<10x10xf32>
    %62 = tpu.matmul %57, %59, %cst_24 {dimension_numbers = #tpu.dot_dimension_numbers<[1], [1], [0], [0], [0, 0, 1, 0], [], []>} : vector<10x16xbf16>, vector<10x16xbf16>, vector<10x10xf32> -> vector<10x10xf32>
    %cst_25 = arith.constant dense<0xFF800000> : vector<10xf32>
    %63 = vector.multi_reduction <maximumf>, %62, %cst_25 [1] : vector<10x10xf32> to vector<10xf32>
    %64 = vector.shape_cast %63 : vector<10xf32> to vector<10x1xf32>
    %65 = vector.broadcast %64 : vector<10x1xf32> to vector<10x10xf32>
    %66 = arith.subf %62, %65 : vector<10x10xf32>
    %67 = math.exp %66 : vector<10x10xf32>
    %cst_26 = arith.constant dense<0.000000e+00> : vector<10xf32>
    %68 = vector.multi_reduction <add>, %67, %cst_26 [1] : vector<10x10xf32> to vector<10xf32>
    %69 = vector.shape_cast %68 : vector<10xf32> to vector<10x1xf32>
    %70 = tpu.reciprocal %69 {approx = true} : vector<10x1xf32> -> vector<10x1xf32>
    %71 = vector.broadcast %70 : vector<10x1xf32> to vector<10x10xf32>
    %72 = arith.mulf %67, %71 : vector<10x10xf32>
    %73 = arith.truncf %72 : vector<10x10xf32> to vector<10x10xbf16>
    %cst_27 = arith.constant dense<0.000000e+00> : vector<10x16xf32>
    %74 = tpu.matmul %73, %61, %cst_27 {dimension_numbers = #tpu.dot_dimension_numbers<[1], [0], [0], [1], [0, 0, 1, 1], [], []>} : vector<10x10xbf16>, vector<10x16xbf16>, vector<10x16xf32> -> vector<10x16xf32>
    %75 = vector.extract_strided_slice %36 {offsets = [0, 32], sizes = [10, 16], strides = [1, 1]} : vector<10x192xf32> to vector<10x16xf32>
    %76 = arith.truncf %75 : vector<10x16xf32> to vector<10x16xbf16>
    %77 = vector.extract_strided_slice %36 {offsets = [0, 96], sizes = [10, 16], strides = [1, 1]} : vector<10x192xf32> to vector<10x16xf32>
    %78 = arith.truncf %77 : vector<10x16xf32> to vector<10x16xbf16>
    %79 = vector.extract_strided_slice %36 {offsets = [0, 160], sizes = [10, 16], strides = [1, 1]} : vector<10x192xf32> to vector<10x16xf32>
    %80 = arith.truncf %79 : vector<10x16xf32> to vector<10x16xbf16>
    %cst_28 = arith.constant dense<0.000000e+00> : vector<10x10xf32>
    %81 = tpu.matmul %76, %78, %cst_28 {dimension_numbers = #tpu.dot_dimension_numbers<[1], [1], [0], [0], [0, 0, 1, 0], [], []>} : vector<10x16xbf16>, vector<10x16xbf16>, vector<10x10xf32> -> vector<10x10xf32>
    %cst_29 = arith.constant dense<0xFF800000> : vector<10xf32>
    %82 = vector.multi_reduction <maximumf>, %81, %cst_29 [1] : vector<10x10xf32> to vector<10xf32>
    %83 = vector.shape_cast %82 : vector<10xf32> to vector<10x1xf32>
    %84 = vector.broadcast %83 : vector<10x1xf32> to vector<10x10xf32>
    %85 = arith.subf %81, %84 : vector<10x10xf32>
    %86 = math.exp %85 : vector<10x10xf32>
    %cst_30 = arith.constant dense<0.000000e+00> : vector<10xf32>
    %87 = vector.multi_reduction <add>, %86, %cst_30 [1] : vector<10x10xf32> to vector<10xf32>
    %88 = vector.shape_cast %87 : vector<10xf32> to vector<10x1xf32>
    %89 = tpu.reciprocal %88 {approx = true} : vector<10x1xf32> -> vector<10x1xf32>
    %90 = vector.broadcast %89 : vector<10x1xf32> to vector<10x10xf32>
    %91 = arith.mulf %86, %90 : vector<10x10xf32>
    %92 = arith.truncf %91 : vector<10x10xf32> to vector<10x10xbf16>
    %cst_31 = arith.constant dense<0.000000e+00> : vector<10x16xf32>
    %93 = tpu.matmul %92, %80, %cst_31 {dimension_numbers = #tpu.dot_dimension_numbers<[1], [0], [0], [1], [0, 0, 1, 1], [], []>} : vector<10x10xbf16>, vector<10x16xbf16>, vector<10x16xf32> -> vector<10x16xf32>
    %94 = vector.extract_strided_slice %36 {offsets = [0, 48], sizes = [10, 16], strides = [1, 1]} : vector<10x192xf32> to vector<10x16xf32>
    %95 = arith.truncf %94 : vector<10x16xf32> to vector<10x16xbf16>
    %96 = vector.extract_strided_slice %36 {offsets = [0, 112], sizes = [10, 16], strides = [1, 1]} : vector<10x192xf32> to vector<10x16xf32>
    %97 = arith.truncf %96 : vector<10x16xf32> to vector<10x16xbf16>
    %98 = vector.extract_strided_slice %36 {offsets = [0, 176], sizes = [10, 16], strides = [1, 1]} : vector<10x192xf32> to vector<10x16xf32>
    %99 = arith.truncf %98 : vector<10x16xf32> to vector<10x16xbf16>
    %cst_32 = arith.constant dense<0.000000e+00> : vector<10x10xf32>
    %100 = tpu.matmul %95, %97, %cst_32 {dimension_numbers = #tpu.dot_dimension_numbers<[1], [1], [0], [0], [0, 0, 1, 0], [], []>} : vector<10x16xbf16>, vector<10x16xbf16>, vector<10x10xf32> -> vector<10x10xf32>
    %cst_33 = arith.constant dense<0xFF800000> : vector<10xf32>
    %101 = vector.multi_reduction <maximumf>, %100, %cst_33 [1] : vector<10x10xf32> to vector<10xf32>
    %102 = vector.shape_cast %101 : vector<10xf32> to vector<10x1xf32>
    %103 = vector.broadcast %102 : vector<10x1xf32> to vector<10x10xf32>
    %104 = arith.subf %100, %103 : vector<10x10xf32>
    %105 = math.exp %104 : vector<10x10xf32>
    %cst_34 = arith.constant dense<0.000000e+00> : vector<10xf32>
    %106 = vector.multi_reduction <add>, %105, %cst_34 [1] : vector<10x10xf32> to vector<10xf32>
    %107 = vector.shape_cast %106 : vector<10xf32> to vector<10x1xf32>
    %108 = tpu.reciprocal %107 {approx = true} : vector<10x1xf32> -> vector<10x1xf32>
    %109 = vector.broadcast %108 : vector<10x1xf32> to vector<10x10xf32>
    %110 = arith.mulf %105, %109 : vector<10x10xf32>
    %111 = arith.truncf %110 : vector<10x10xf32> to vector<10x10xbf16>
    %cst_35 = arith.constant dense<0.000000e+00> : vector<10x16xf32>
    %112 = tpu.matmul %111, %99, %cst_35 {dimension_numbers = #tpu.dot_dimension_numbers<[1], [0], [0], [1], [0, 0, 1, 1], [], []>} : vector<10x10xbf16>, vector<10x16xbf16>, vector<10x16xf32> -> vector<10x16xf32>
    %113 = tpu.concatenate %55, %74, %93, %112 in 1 : vector<10x16xf32>, vector<10x16xf32>, vector<10x16xf32>, vector<10x16xf32> -> vector<10x64xf32>
    %114 = arith.truncf %113 : vector<10x64xf32> to vector<10x64xbf16>
    %c0_36 = arith.constant 0 : index
    %c0_37 = arith.constant 0 : index
    %c0_38 = arith.constant 0 : index
    %115 = vector.load %arg7[%c0_36, %c0_37, %c0_38] : memref<1x64x64xbf16, #tpu.memory_space<vmem>>, vector<1x64x64xbf16>
    %116 = vector.shape_cast %115 : vector<1x64x64xbf16> to vector<64x64xbf16>
    %cst_39 = arith.constant dense<0.000000e+00> : vector<10x64xf32>
    %117 = tpu.matmul %114, %116, %cst_39 {dimension_numbers = #tpu.dot_dimension_numbers<[1], [0], [0], [1], [0, 0, 1, 1], [], []>} : vector<10x64xbf16>, vector<64x64xbf16>, vector<10x64xf32> -> vector<10x64xf32>
    %c0_40 = arith.constant 0 : index
    %c0_41 = arith.constant 0 : index
    %c0_42 = arith.constant 0 : index
    %118 = vector.load %arg8[%c0_40, %c0_41, %c0_42] : memref<1x1x64xf32, #tpu.memory_space<vmem>>, vector<1x1x64xf32>
    %119 = vector.shape_cast %118 : vector<1x1x64xf32> to vector<1x64xf32>
    %120 = vector.broadcast %119 : vector<1x64xf32> to vector<10x64xf32>
    %121 = arith.addf %117, %120 : vector<10x64xf32>
    %122 = arith.addf %4, %121 : vector<10x64xf32>
    %c0_43 = arith.constant 0 : index
    %c0_44 = arith.constant 0 : index
    %c0_45 = arith.constant 0 : index
    %123 = vector.load %arg9[%c0_43, %c0_44, %c0_45] : memref<1x1x64xf32, #tpu.memory_space<vmem>>, vector<1x1x64xf32>
    %124 = vector.shape_cast %123 : vector<1x1x64xf32> to vector<1x64xf32>
    %c0_46 = arith.constant 0 : index
    %c0_47 = arith.constant 0 : index
    %c0_48 = arith.constant 0 : index
    %125 = vector.load %arg10[%c0_46, %c0_47, %c0_48] : memref<1x1x64xf32, #tpu.memory_space<vmem>>, vector<1x1x64xf32>
    %126 = vector.shape_cast %125 : vector<1x1x64xf32> to vector<1x64xf32>
    %cst_49 = arith.constant dense<0.000000e+00> : vector<10xf32>
    %127 = vector.multi_reduction <add>, %122, %cst_49 [1] : vector<10x64xf32> to vector<10xf32>
    %128 = vector.shape_cast %127 : vector<10xf32> to vector<10x1xf32>
    %cst_50 = arith.constant 6.400000e+01 : f32
    %129 = vector.broadcast %cst_50 : f32 to vector<10x1xf32>
    %130 = arith.divf %128, %129 : vector<10x1xf32>
    %131 = vector.broadcast %130 : vector<10x1xf32> to vector<10x64xf32>
    %132 = arith.subf %122, %131 : vector<10x64xf32>
    %133 = arith.mulf %132, %132 : vector<10x64xf32>
    %cst_51 = arith.constant dense<0.000000e+00> : vector<10xf32>
    %134 = vector.multi_reduction <add>, %133, %cst_51 [1] : vector<10x64xf32> to vector<10xf32>
    %135 = vector.shape_cast %134 : vector<10xf32> to vector<10x1xf32>
    %cst_52 = arith.constant 6.400000e+01 : f32
    %136 = vector.broadcast %cst_52 : f32 to vector<10x1xf32>
    %137 = arith.divf %135, %136 : vector<10x1xf32>
    %cst_53 = arith.constant 9.99999997E-7 : f32
    %138 = vector.broadcast %cst_53 : f32 to vector<10x1xf32>
    %139 = arith.addf %137, %138 : vector<10x1xf32>
    %140 = math.rsqrt %139 : vector<10x1xf32>
    %141 = vector.broadcast %140 : vector<10x1xf32> to vector<10x64xf32>
    %142 = arith.mulf %132, %141 : vector<10x64xf32>
    %143 = vector.broadcast %124 : vector<1x64xf32> to vector<10x64xf32>
    %144 = arith.mulf %142, %143 : vector<10x64xf32>
    %145 = vector.broadcast %126 : vector<1x64xf32> to vector<10x64xf32>
    %146 = arith.addf %144, %145 : vector<10x64xf32>
    %147 = arith.truncf %146 : vector<10x64xf32> to vector<10x64xbf16>
    %c0_54 = arith.constant 0 : index
    %c0_55 = arith.constant 0 : index
    %c0_56 = arith.constant 0 : index
    %148 = vector.load %arg11[%c0_54, %c0_55, %c0_56] : memref<1x64x256xbf16, #tpu.memory_space<vmem>>, vector<1x64x256xbf16>
    %149 = vector.shape_cast %148 : vector<1x64x256xbf16> to vector<64x256xbf16>
    %cst_57 = arith.constant dense<0.000000e+00> : vector<10x256xf32>
    %150 = tpu.matmul %147, %149, %cst_57 {dimension_numbers = #tpu.dot_dimension_numbers<[1], [0], [0], [1], [0, 0, 1, 1], [], []>} : vector<10x64xbf16>, vector<64x256xbf16>, vector<10x256xf32> -> vector<10x256xf32>
    %c0_58 = arith.constant 0 : index
    %c0_59 = arith.constant 0 : index
    %c0_60 = arith.constant 0 : index
    %151 = vector.load %arg12[%c0_58, %c0_59, %c0_60] : memref<1x1x256xf32, #tpu.memory_space<vmem>>, vector<1x1x256xf32>
    %152 = vector.shape_cast %151 : vector<1x1x256xf32> to vector<1x256xf32>
    %153 = vector.broadcast %152 : vector<1x256xf32> to vector<10x256xf32>
    %154 = arith.addf %150, %153 : vector<10x256xf32>
    %cst_61 = arith.constant 5.000000e-01 : f32
    %155 = vector.broadcast %cst_61 : f32 to vector<10x256xf32>
    %156 = arith.mulf %155, %154 : vector<10x256xf32>
    %cst_62 = arith.constant 4.471500e-02 : f32
    %157 = vector.broadcast %cst_62 : f32 to vector<10x256xf32>
    %158 = arith.mulf %157, %154 : vector<10x256xf32>
    %159 = arith.mulf %158, %154 : vector<10x256xf32>
    %160 = arith.mulf %159, %154 : vector<10x256xf32>
    %161 = arith.addf %154, %160 : vector<10x256xf32>
    %cst_63 = arith.constant 0.797884583 : f32
    %162 = vector.broadcast %cst_63 : f32 to vector<10x256xf32>
    %163 = arith.mulf %162, %161 : vector<10x256xf32>
    %164 = math.tanh %163 : vector<10x256xf32>
    %cst_64 = arith.constant 1.000000e+00 : f32
    %165 = vector.broadcast %cst_64 : f32 to vector<10x256xf32>
    %166 = arith.addf %165, %164 : vector<10x256xf32>
    %167 = arith.mulf %156, %166 : vector<10x256xf32>
    %168 = arith.truncf %167 : vector<10x256xf32> to vector<10x256xbf16>
    %c0_65 = arith.constant 0 : index
    %c0_66 = arith.constant 0 : index
    %c0_67 = arith.constant 0 : index
    %169 = vector.load %arg13[%c0_65, %c0_66, %c0_67] : memref<1x256x64xbf16, #tpu.memory_space<vmem>>, vector<1x256x64xbf16>
    %170 = vector.shape_cast %169 : vector<1x256x64xbf16> to vector<256x64xbf16>
    %cst_68 = arith.constant dense<0.000000e+00> : vector<10x64xf32>
    %171 = tpu.matmul %168, %170, %cst_68 {dimension_numbers = #tpu.dot_dimension_numbers<[1], [0], [0], [1], [0, 0, 1, 1], [], []>} : vector<10x256xbf16>, vector<256x64xbf16>, vector<10x64xf32> -> vector<10x64xf32>
    %c0_69 = arith.constant 0 : index
    %c0_70 = arith.constant 0 : index
    %c0_71 = arith.constant 0 : index
    %172 = vector.load %arg14[%c0_69, %c0_70, %c0_71] : memref<1x1x64xf32, #tpu.memory_space<vmem>>, vector<1x1x64xf32>
    %173 = vector.shape_cast %172 : vector<1x1x64xf32> to vector<1x64xf32>
    %174 = vector.broadcast %173 : vector<1x64xf32> to vector<10x64xf32>
    %175 = arith.addf %171, %174 : vector<10x64xf32>
    %176 = arith.addf %122, %175 : vector<10x64xf32>
    %c0_72 = arith.constant 0 : index
    %c0_73 = arith.constant 0 : index
    %c0_74 = arith.constant 0 : index
    %177 = vector.load %arg15[%c0_72, %c0_73, %c0_74] : memref<1x10x64xf32, #tpu.memory_space<vmem>>, vector<1x10x64xf32>
    %178 = vector.shape_cast %177 : vector<1x10x64xf32> to vector<10x64xf32>
    %179 = vector.shape_cast %176 : vector<10x64xf32> to vector<1x10x64xf32>
    tpu.vector_store %arg15[%c0_72, %c0_73, %c0_74], %179 {strides = array<i32>} : memref<1x10x64xf32, #tpu.memory_space<vmem>>, vector<1x10x64xf32>,
    return
  }
  func.func @transform_0(%arg0: i32, %arg1: i32) -> (i32, i32, i32) {
    %c0_i32 = arith.constant 0 : i32
    %c0_i32_0 = arith.constant 0 : i32
    %c0_i32_1 = arith.constant 0 : i32
    return %arg0, %c0_i32, %c0_i32_0 : i32, i32, i32
  }
  func.func @transform_1(%arg0: i32, %arg1: i32) -> (i32, i32, i32) {
    %c0_i32 = arith.constant 0 : i32
    %c0_i32_0 = arith.constant 0 : i32
    %c0_i32_1 = arith.constant 0 : i32
    return %arg1, %c0_i32, %c0_i32_0 : i32, i32, i32
  }
  func.func @transform_2(%arg0: i32, %arg1: i32) -> (i32, i32, i32) {
    %c0_i32 = arith.constant 0 : i32
    %c0_i32_0 = arith.constant 0 : i32
    %c0_i32_1 = arith.constant 0 : i32
    return %arg1, %c0_i32, %c0_i32_0 : i32, i32, i32
  }
  func.func @transform_3(%arg0: i32, %arg1: i32) -> (i32, i32, i32) {
    %c0_i32 = arith.constant 0 : i32
    %c0_i32_0 = arith.constant 0 : i32
    %c0_i32_1 = arith.constant 0 : i32
    return %arg1, %c0_i32, %c0_i32_0 : i32, i32, i32
  }
  func.func @transform_4(%arg0: i32, %arg1: i32) -> (i32, i32, i32) {
    %c0_i32 = arith.constant 0 : i32
    %c0_i32_0 = arith.constant 0 : i32
    %c0_i32_1 = arith.constant 0 : i32
    return %arg1, %c0_i32, %c0_i32_0 : i32, i32, i32
  }
  func.func @transform_5(%arg0: i32, %arg1: i32) -> (i32, i32, i32) {
    %c0_i32 = arith.constant 0 : i32
    %c0_i32_0 = arith.constant 0 : i32
    %c0_i32_1 = arith.constant 0 : i32
    return %arg1, %c0_i32, %c0_i32_0 : i32, i32, i32
  }
  func.func @transform_6(%arg0: i32, %arg1: i32) -> (i32, i32, i32) {
    %c0_i32 = arith.constant 0 : i32
    %c0_i32_0 = arith.constant 0 : i32
    %c0_i32_1 = arith.constant 0 : i32
    return %arg1, %c0_i32, %c0_i32_0 : i32, i32, i32
  }
  func.func @transform_7(%arg0: i32, %arg1: i32) -> (i32, i32, i32) {
    %c0_i32 = arith.constant 0 : i32
    %c0_i32_0 = arith.constant 0 : i32
    %c0_i32_1 = arith.constant 0 : i32
    return %arg1, %c0_i32, %c0_i32_0 : i32, i32, i32
  }
  func.func @transform_8(%arg0: i32, %arg1: i32) -> (i32, i32, i32) {
    %c0_i32 = arith.constant 0 : i32
    %c0_i32_0 = arith.constant 0 : i32
    %c0_i32_1 = arith.constant 0 : i32
    return %arg1, %c0_i32, %c0_i32_0 : i32, i32, i32
  }
  func.func @transform_9(%arg0: i32, %arg1: i32) -> (i32, i32, i32) {
    %c0_i32 = arith.constant 0 : i32
    %c0_i32_0 = arith.constant 0 : i32
    %c0_i32_1 = arith.constant 0 : i32
    return %arg1, %c0_i32, %c0_i32_0 : i32, i32, i32
  }
  func.func @transform_10(%arg0: i32, %arg1: i32) -> (i32, i32, i32) {
    %c0_i32 = arith.constant 0 : i32
    %c0_i32_0 = arith.constant 0 : i32
    %c0_i32_1 = arith.constant 0 : i32
    return %arg1, %c0_i32, %c0_i32_0 : i32, i32, i32
  }
  func.func @transform_11(%arg0: i32, %arg1: i32) -> (i32, i32, i32) {
    %c0_i32 = arith.constant 0 : i32
    %c0_i32_0 = arith.constant 0 : i32
    %c0_i32_1 = arith.constant 0 : i32
    return %arg1, %c0_i32, %c0_i32_0 : i32, i32, i32
  }
  func.func @transform_12(%arg0: i32, %arg1: i32) -> (i32, i32, i32) {
    %c0_i32 = arith.constant 0 : i32
    %c0_i32_0 = arith.constant 0 : i32
    %c0_i32_1 = arith.constant 0 : i32
    return %arg1, %c0_i32, %c0_i32_0 : i32, i32, i32
  }
  func.func @transform_13(%arg0: i32, %arg1: i32) -> (i32, i32, i32) {
    %c0_i32 = arith.constant 0 : i32
    %c0_i32_0 = arith.constant 0 : i32
    %c0_i32_1 = arith.constant 0 : i32
    return %arg0, %c0_i32, %c0_i32_0 : i32, i32, i32
  }
}

module attributes {stable_mosaic.version = 11 : i64} {
  func.func @_mse_kernel(%arg0: i32, %arg1: memref<8x256xf32, #tpu.memory_space<vmem>>, %arg2: memref<8x256xf32, #tpu.memory_space<vmem>>, %arg3: memref<1x1xf32, #tpu.memory_space<vmem>>) attributes {dimension_semantics = [#tpu.dimension_semantics<arbitrary>], iteration_bounds = array<i64: 1>, scalar_prefetch = 0 : i64, scratch_operands = 0 : i64, tpu.core_type = #tpu.core_type<tc>, window_params = [{transform_indices = @transform_0, window_bounds = array<i64: 8, 256>}, {transform_indices = @transform_1, window_bounds = array<i64: 8, 256>}, {pipeline_mode = #tpu.pipeline_mode<synchronous>, transform_indices = @transform_2, window_bounds = array<i64: 1, 1>}]} {
    %c0_i32 = arith.constant 0 : i32
    %0 = arith.cmpi eq, %arg0, %c0_i32 : i32
    %1 = arith.extui %0 : i1 to i32
    %c0_i32_0 = arith.constant 0 : i32
    %2 = arith.cmpi ne, %1, %c0_i32_0 : i32
    scf.if %2 {
      %cst_8 = arith.constant 0.000000e+00 : f32
      %15 = vector.broadcast %cst_8 : f32 to vector<1x1xf32>
      %c0_9 = arith.constant 0 : index
      %c0_10 = arith.constant 0 : index
      %16 = vector.load %arg3[%c0_9, %c0_10] : memref<1x1xf32, #tpu.memory_space<vmem>>, vector<1x1xf32>
      tpu.vector_store %arg3[%c0_9, %c0_10], %15 {strides = array<i32>} : memref<1x1xf32, #tpu.memory_space<vmem>>, vector<1x1xf32>,
    } else {
    }
    %c0 = arith.constant 0 : index
    %c0_1 = arith.constant 0 : index
    %3 = vector.load %arg1[%c0, %c0_1] : memref<8x256xf32, #tpu.memory_space<vmem>>, vector<8x256xf32>
    %c0_2 = arith.constant 0 : index
    %c0_3 = arith.constant 0 : index
    %4 = vector.load %arg2[%c0_2, %c0_3] : memref<8x256xf32, #tpu.memory_space<vmem>>, vector<8x256xf32>
    %5 = arith.subf %3, %4 : vector<8x256xf32>
    %c0_4 = arith.constant 0 : index
    %c0_5 = arith.constant 0 : index
    %6 = vector.load %arg3[%c0_4, %c0_5] : memref<1x1xf32, #tpu.memory_space<vmem>>, vector<1x1xf32>
    %7 = arith.mulf %5, %5 : vector<8x256xf32>
    %8 = vector.shape_cast %7 : vector<8x256xf32> to vector<1x8x256xf32>
    %cst = arith.constant dense<0.000000e+00> : vector<1xf32>
    %9 = vector.multi_reduction <add>, %8, %cst [1, 2] : vector<1x8x256xf32> to vector<1xf32>
    %10 = vector.shape_cast %9 : vector<1xf32> to vector<1x1x1xf32>
    %11 = vector.extract %10[0, 0, 0] : f32 from vector<1x1x1xf32>
    %12 = vector.broadcast %11 : f32 to vector<1x1xf32>
    %13 = arith.addf %6, %12 : vector<1x1xf32>
    %c0_6 = arith.constant 0 : index
    %c0_7 = arith.constant 0 : index
    %14 = vector.load %arg3[%c0_6, %c0_7] : memref<1x1xf32, #tpu.memory_space<vmem>>, vector<1x1xf32>
    tpu.vector_store %arg3[%c0_6, %c0_7], %13 {strides = array<i32>} : memref<1x1xf32, #tpu.memory_space<vmem>>, vector<1x1xf32>,
    return
  }
  func.func @transform_0(%arg0: i32) -> (i32, i32) {
    %c0_i32 = arith.constant 0 : i32
    %c0_i32_0 = arith.constant 0 : i32
    return %arg0, %c0_i32 : i32, i32
  }
  func.func @transform_1(%arg0: i32) -> (i32, i32) {
    %c0_i32 = arith.constant 0 : i32
    %c0_i32_0 = arith.constant 0 : i32
    return %arg0, %c0_i32 : i32, i32
  }
  func.func @transform_2(%arg0: i32) -> (i32, i32) {
    %c0_i32 = arith.constant 0 : i32
    %c0_i32_0 = arith.constant 0 : i32
    %c0_i32_1 = arith.constant 0 : i32
    return %c0_i32, %c0_i32_0 : i32, i32
  }
}

</mosaic_0001>

<bundles_post_ra>
// kernel: tpu_custom_call.1
= control target key start
LH: loop header
LB: loop body
LE: loop exit
PB: predicated region body
PF: predicated region fallthrough
CT: control target
= control target key end

     0   :  { %7 = vsyncpa [#allocation3], 0  ;;  %s651_s0 = inlined_call_operand.hbm [shape: f32[8,128], index: 0, kind: input, shape index: {}]   ;;  %s652_s1 = inlined_call_operand.hbm [shape: f32[16,128], index: 1, kind: input, shape index: {}]   ;;  %s653_s2 = inlined_call_operand.hbm [shape: f32[16,128], index: 2, kind: output, shape index: {}]  }
   0x1   :  { %8 = vsyncpa [#allocation6], 0 }
   0x2   :  { %10 = vsyncpa [#allocation6 + $0x1], 0 }
   0x3   :  { %11 = vsyncpa [#allocation4], 0 }
   0x4   :  { %13 = vsyncpa [#allocation4 + $0x1], 0  ;;  %s485_s9 = smov 0   ;;  %s487_s10 = smov 0  }
   0x5   :  { %s489_s11 = smov 0   ;;  %s491_s12 = smov 0  }
   0x6 LB: > { %s506_s13 = sadd.s32 4294967295, %s465_s12   ;;  %s272_s14 = sadd.s32 4294967294, %s465_s12   ;;  %s465_s12 = sphi %s491_s12, %s676_s12   ;;  %s461_s11 = sphi %s489_s11, %s675_s11   ;;  %s457_s10 = sphi %s487_s10, %s674_s10   ;;  %s453_s9 = sphi %s485_s9, %s673_s9  }
   0x7   : > { %p60_p0 = scmp.ne.s32.totalorder %s457_s10, %s453_s9  ;;  %p654_p1 = scmp.eq.s32.totalorder %s506_s13, 0 }
   0x8   : > { %p90_p3 = scmp.eq.s32.totalorder %s272_s14, 1  ;;  %p273_p5 = scmp.ge.s32.totalorder %s465_s12, 1 }
   0x9   : > { %p515_p4 = por %p654_p1, %p60_p0  ;;  %p97_p7 = scmp.lt.s32.totalorder %s465_s12, 3 }
   0xa   : > { %p520_p6 = por %p90_p3, %p60_p0  ;;  %s467_s18 = smov [#allocation2]  }
   0xb   : > { %s658_s15 = scalar_select %p515_p4, 1, 0 }
   0xc   : > { %s659_s16 = scalar_select %p520_p6, 1, 0 }
   0xd   : > { %p525_p8 = pnand %p273_p5, %p97_p7  ;;  %s110_s19 = sshll.u32 %s467_s18, 4  ;;  %s111_s19 = int_to_ptr.vmem [resolvable:$true] %s110_s19 }
   0xe   : > { %s533_s20 = sadd.s32 1, %s465_s12   ;;  %s47_s24 = sadd.s32 1, %s461_s11 }
   0xf   : > { %s660_s17 = scalar_select %p525_p8, 1, 0 }
  0x10   : > { %p294_p10 = pneg %p525_p8  ;;  %s44_s22 = ssub.s32 %s465_s12, %s533_s20 }
  0x11   : > { %p543_p12 = scmp.eq.s32.totalorder %s44_s22, 0  ;;  %p54_p13 = scmp.ne.s32.totalorder %s461_s11, %s457_s10 }
  0x12   : > { %p537_p11 = pnand %p294_p10, %p654_p1  ;;  %s354_s25 = scalar_lea.vmem %s111_s19, 128 }
  0x13   : > { %p355_p3 = scmp.ne.s32.totalorder %s111_s19, %s354_s25  ;;  %p362_p9 = scmp.lt.s32.totalorder %s111_s19, %s111_s19 }
  0x14   : > { %p345_p0 = pneg %p537_p11  ;;  %p363_p2 = scmp.lt.s32.totalorder %s354_s25, %s354_s25 }
  0x16   : > { %p357_p5 = pnand %p355_p3, %p345_p0  ;;  %p364_p10 = por %p363_p2, %p362_p9 }
  0x18   : > { %p358_p7 = pneg %p357_p5 }
  0x1a   : > { %p365_p1 = pnand %p364_p10, %p358_p7 }
  0x1c   : > { %368 = shalt.err (!%p365_p1)
}
  0x1d   : > { %297 = dma.hbm_to_vmem [thread:$0]  (!%p537_p11), %s651_s0, 128, %s111_s19, [#allocation3]  }
  0x1e   : > { %s560_s28 = scalar_select %p543_p12, %s461_s11, %s47_s24  }
  0x1f   : > { %p55_p1 = scmp.eq.s32.totalorder %s465_s12, 0  ;;  %p663_p2 = scmp.eq.s32.totalorder %s506_s13, 1 }
  0x20   : > { %p307_p0 = scmp.lt.s32.totalorder %s465_s12, 2  ;;  %s121_s30 = sand.u32 1, %s461_s11  }
  0x21   : > { %p568_p9 = por %p663_p2, %p54_p13  ;;  %p56_p3 = por %p55_p1, %p54_p13 }
  0x22   : > { %s276_s3 = sshll.u32 %s121_s30, 3  ;;  %s277_s4 = sshll.u32 %s465_s12, 7 }
  0x23   : > { %s664_s29 = scalar_select %p568_p9, 1, 0 }
  0x24   : > { %s581_s7 = scalar_lea.hbm %s652_s1, %s277_s4  ;;  %s125_s8 = scalar_lea.vmem [#allocation5], %s276_s3 }
  0x25   : > { %s132_s14 = sshll.u32 %s125_s8, 4  ;;  %p583_p11 = pnand %p307_p0, %p56_p3  ;;  %s133_s14 = int_to_ptr.vmem [resolvable:$true] %s132_s14 }
  0x26   : > { %s122_s19 = scalar_lea.sflag [#allocation6], %s121_s30  ;;  %s369_s21 = scalar_lea.hbm %s581_s7, 128 }
  0x27   : > { %p370_p12 = scmp.ne.s32.totalorder %s581_s7, %s369_s21  ;;  %p371_p13 = pneg %p583_p11 }
  0x28   : > { %s374_s24 = scalar_lea.hbm %s652_s1, 256  ;;  %p375_p10 = scmp.lt.s32.totalorder %s581_s7, %s652_s1 }
  0x29   : > { %p372_p5 = pnand %p371_p13, %p370_p12  ;;  %p376_p1 = scmp.lt.s32.totalorder %s374_s24, %s369_s21 }
  0x2b   : > { %p373_p7 = pneg %p372_p5  ;;  %p377_p2 = por %p376_p1, %p375_p10 }
  0x2d   : > { %p378_p0 = pnand %p377_p2, %p373_p7 }
  0x2f   : > { %381 = shalt.err (!%p378_p0)
}
  0x30   : > { %s382_s27 = scalar_lea.vmem %s133_s14, 128  ;;  %s468_s30 = smov [#allocation5]  }
  0x31   : > { %p383_p3 = scmp.ne.s32.totalorder %s133_s14, %s382_s27  ;;  %s387_s3 = sshll.u32 %s468_s30, 4  ;;  %s388_s3 = int_to_ptr.vmem [resolvable:$false] %s387_s3 }
  0x32   : > { %s389_s4 = scalar_lea.vmem %s388_s3, 256  ;;  %p390_p12 = scmp.lt.s32.totalorder %s133_s14, %s388_s3 }
  0x33   : > { %p385_p6 = pnand %p383_p3, %p371_p13  ;;  %p391_p5 = scmp.lt.s32.totalorder %s389_s4, %s382_s27 }
  0x35   : > { %p386_p9 = pneg %p385_p6  ;;  %p392_p4 = por %p391_p5, %p390_p12 }
  0x37   : > { %p393_p8 = pnand %p392_p4, %p386_p9 }
  0x39   : > { %396 = shalt.err (!%p393_p8)
}
  0x3a   : > { %301 = dma.hbm_to_vmem [thread:$0]  (!%p583_p11), %s581_s7, 128, %s133_s14, %s122_s19  }
  0x3b   : > { %p666_p7 = scmp.ne.s32.totalorder %s660_s17, 0 }
  0x3c   : > { %p667_p10 = scmp.eq.s32.totalorder (!%p666_p7), %s506_s13, 0 }
  0x3d   : > { %141 = sbr.rel (%p666_p7) target bundleno = 96 (0x60), region = 28 }
  0x42   : > { %440 = dma.done.wait (%p667_p10), [#allocation3], 128   ;;  %p668_p6 = pmov %p667_p10 }
  0x43   : > { %s608_s5 = sand.u32 1, %s457_s10   ;;  %p669_p4 = scmp.ne.s32.totalorder %s658_s15, 0 }
  0x44   : > { %442 = vsyncadd (%p668_p6), [#allocation3], 4294967168  ;;  %s280_s6 = sshll.u32 %s608_s5, 3  ;;  %s148_s8 = scalar_lea.sflag [#allocation6], %s608_s5 }
  0x45   : > { %s151_s18 = scalar_lea.vmem [#allocation5], %s280_s6 }
  0x46   : > { %444 = dma.done.wait (%p669_p4), %s148_s8, 128  }
  0x47   : > { %446 = vsyncadd (%p669_p4), %s148_s8, 4294967168  ;;  %s171_s17 = scalar_lea.vmem [#allocation7], %s280_s6  ;;  %s283_s14 = sshll.u32 %s506_s13, 7  ;;  %v172_v0 = vld [vmem:[%s151_s18] sm:$0xff]  ;;  %v173_v1 = vld [vmem:[#allocation2] sm:$0xff] }
  0x48   : > { %s190_s7 = sshll.u32 %s171_s17, 4  ;;  %v174_v2 = vadd.f32 %v173_v1, %v172_v0  ;;  %s188_s22 = scalar_lea.hbm %s653_s2, %s283_s14  ;;  %s191_s7 = int_to_ptr.vmem [resolvable:$true] %s190_s7 }
  0x49   : > { %s177_s23 = scalar_lea.sflag [#allocation4], %s608_s5  ;;  %s397_s24 = scalar_lea.vmem %s191_s7, 128 }
  0x4a   : > { %175 = vst [vmem:[%s171_s17] sm:$0xff] %v174_v2  ;;  %p398_p8 = scmp.ne.s32.totalorder %s191_s7, %s397_s24  ;;  %p670_p9 = scmp.ne.s32.totalorder %s664_s29, 0 }
  0x4b   : > { %s469_s15 = smov [#allocation7]  }
  0x4c   : > { %p399_p11 = pnand %p398_p8, %p670_p9  ;;  %s401_s25 = sshll.u32 %s469_s15, 4  ;;  %s402_s25 = int_to_ptr.vmem [resolvable:$false] %s401_s25 }
  0x4d   : > { %s403_s26 = scalar_lea.vmem %s402_s25, 256  ;;  %p404_p1 = scmp.lt.s32.totalorder %s191_s7, %s402_s25 }
  0x4e   : > { %p400_p13 = pneg %p399_p11  ;;  %p405_p2 = scmp.lt.s32.totalorder %s403_s26, %s397_s24 }
  0x50   : > { %p406_p0 = por %p405_p2, %p404_p1 }
  0x52   : > { %p407_p3 = pnand %p406_p0, %p400_p13 }
  0x54   : > { %410 = shalt.err (!%p407_p3)
}
  0x55   : > { %s411_s13 = scalar_lea.hbm %s188_s22, 128  ;;  %s415_s3 = scalar_lea.hbm %s653_s2, 256 }
  0x56   : > { %p412_p12 = scmp.ne.s32.totalorder %s188_s22, %s411_s13  ;;  %p416_p10 = scmp.lt.s32.totalorder %s188_s22, %s653_s2 }
  0x57   : > { %p417_p6 = scmp.lt.s32.totalorder %s415_s3, %s411_s13 }
  0x58   : > { %p413_p5 = pnand %p412_p12, %p670_p9 }
  0x59   : > { %p418_p4 = por %p417_p6, %p416_p10 }
  0x5a   : > { %p414_p7 = pneg %p413_p5 }
  0x5c   : > { %p419_p8 = pnand %p418_p4, %p414_p7 }
  0x5e   : > { %422 = shalt.err (!%p419_p8)
}
  0x5f   : > { %292 = dma.vmem_to_hbm [thread:$0]  (%p670_p9), %s191_s7, 128, %s188_s22, %s177_s23  }
  0x60 PF: > { %s202_s6 = sand.u32 1, %s453_s9   ;;  %p671_p11 = scmp.ne.s32.totalorder %s659_s16, 0 }
  0x61   : > { %p672_p13 = scmp.ge.s32.totalorder %s465_s12, 2  ;;  %s203_s8 = scalar_lea.sflag [#allocation4], %s202_s6 }
  0x63   : > { %p303_p1 = pnand %p672_p13, %p671_p11 }
  0x65   : > { %p304_p2 = pneg %p303_p1 }
  0x67   : > { %448 = dma.done.wait (%p304_p2), %s203_s8, 128  }
  0x68   : > { %450 = vsyncadd (%p304_p2), %s203_s8, 4294967168  ;;  %p16_p0 = scmp.ge.s32.totalorder %s533_s20, 4   ;;  %s673_s9 = smov %s457_s10 }
  0x69   : > { %s674_s10 = smov %s461_s11  ;;  %s675_s11 = smov %s560_s28 }
  0x6a   : > { %s676_s12 = smov %s533_s20  ;;  %18 = sbr.rel (!%p16_p0) target bundleno = 6 (0x6), region = 78 }
  0x6f   :  { %208 = vsyncpa [#allocation3], 1 }
  0x70   :  { %210 = vsyncpa [#allocation3 + $0x1], 1 }
  0x71   :  { %211 = vsyncpa [#allocation6], 1 }
  0x72   :  { %213 = vsyncpa [#allocation6 + $0x1], 1 }
  0x73   :  { %214 = vsyncpa [#allocation4], 1 }
  0x74   :  { %216 = vsyncpa [#allocation4 + $0x1], 1 }

// kernel: _lambda_.6
= control target key start
LH: loop header
LB: loop body
LE: loop exit
PB: predicated region body
PF: predicated region fallthrough
CT: control target
= control target key end

     0   :  { %vm30_vm0 = vcmask 523264   ;;  %v309_v7 = vmov 0.0   ;;  %vm310_vm1 = vmmov 0   ;;  %v311_v30 = vmov 0   ;;  %s413_s0 = inlined_call_operand.vmem [shape: f32[8,64], index: 0, kind: input, shape index: {}]   ;;  %s414_s3 = inlined_call_operand.vmem [shape: bf16[64,64], index: 3, kind: input, shape index: {}]   ;;  %s415_s5 = inlined_call_operand.vmem [shape: bf16[64,256], index: 5, kind: input, shape index: {}]   ;;  %s416_s1 = inlined_call_operand.vmem [shape: f32[1,64], index: 1, kind: input, shape index: {}]   ;;  %s417_s2 = inlined_call_operand.vmem [shape: f32[1,64], index: 2, kind: input, shape index: {}, may-alias: {2,4}]   ;;  %s418_s4 = inlined_call_operand.vmem [shape: f32[1,64], index: 4, kind: input, shape index: {}, may-alias: {2,4}]   ;;  %s419_s6 = inlined_call_operand.vmem [shape: f32[1,256], index: 6, kind: input, shape index: {}]   ;;  %s420_s7 = inlined_call_operand.vmem [shape: f32[8,256], index: 7, kind: output, shape index: {}]  }
   0x1   :  { %v27_v0 = vld [vmem:[%s413_s0] sm:$0xff]  ;;  %276 = vmatprep.subr.bf16.mxu0 %v309_v7  ;;  %v291_v8 = vld [vmem:[%s414_s3 + $0x18] sm:$0xff]   ;;  %284 = vmatprep.mubr.msk.bf16.mxu0 %vm310_vm1, %v309_v7  ;;  %v292_v9 = vld [vmem:[%s414_s3 + $0x10] sm:$0xff]   ;;  %v154_v39 = vlaneseq }
   0x2   :  { %v31_v1 = vsel %vm30_vm0, %v27_v0, 0.0  ;;  %277 = vmatpush3.bf16.msra.mxu0 %v291_v8  ;;  %v293_v10 = vld [vmem:[%s414_s3 + $0x8] sm:$0xff]   ;;  %v294_v11 = vld [vmem:[%s414_s3] sm:$0xff]   ;;  %v295_v12 = vld [vmem:[%s415_s5 + $0x34] ss:$8 sps:$4 sm:$0xff]   ;;  %239 = vmatprep.mubr.bf16.mxu1 %v311_v30 }
   0x3   :  { %32 = vadd.xlane.f32.xlu0 %v31_v1  ;;  %278 = vmatprep.subr.bf16.mxu0 %v309_v7  ;;  %v297_v13 = vld [vmem:[%s415_s5 + $0x30] ss:$8 sps:$4 sm:$0xff]   ;;  %v298_v14 = vld [vmem:[%s415_s5 + $0x24] ss:$8 sps:$4 sm:$0xff]   ;;  %v300_v15 = vld [vmem:[%s415_s5 + $0x20] ss:$8 sps:$4 sm:$0xff]  }
   0x4   :  { %215 = vmatprep.subr.bf16.mxu1 %v295_v12  ;;  %v301_v16 = vld [vmem:[%s415_s5 + $0x14] ss:$8 sps:$4 sm:$0xff]   ;;  %v254_v21 = vld [vmem:[%s416_s1] ss:$0 sm:$0xff]  ;;  %v303_v27 = vld [vmem:[%s415_s5 + $0x10] ss:$8 sps:$4 sm:$0xff]  }
   0x5   :  { %216 = vmatpush1.bf16.msra.mxu1 %v297_v13  ;;  %v255_v23 = vld [vmem:[%s417_s2] ss:$0 sm:$0xff]  ;;  %v304_v28 = vld [vmem:[%s415_s5 + $0x4] ss:$8 sps:$4 sm:$0xff]   ;;  %v155_v40 = vshrl.u32 %v154_v39, 7 }
   0x6   :  { %279 = vmatpush3.bf16.msra.mxu0 %v292_v9  ;;  %217 = vmatprep.subr.bf16.mxu1 %v298_v14  ;;  %v306_v29 = vld [vmem:[%s415_s5] ss:$8 sps:$4 sm:$0xff]  }
   0x7   :  { %280 = vmatprep.subr.bf16.mxu0 %v309_v7  ;;  %v256_v31 = vld [vmem:[%s418_s4] ss:$0 sm:$0xff]  ;;  %v156_v41 = vsub.s32 0, %v155_v40  ;;  %v160_v43 = vsub.s32 1, %v155_v40 }
   0x8   :  { %v152_v42 = vld [vmem:[%s419_s6] sm:$0x3] }
   0x9   :  { %218 = vmatpush1.bf16.msra.mxu1 %v300_v15  ;;  %v157_v44 = vrot.slane %v152_v42, %v156_v41  ;;  %v161_v45 = vrot.slane %v152_v42, %v160_v43 }
   0xa   :  { %281 = vmatpush3.bf16.msra.mxu0 %v293_v10  ;;  %219 = vmatprep.subr.bf16.mxu1 %v301_v16 }
   0xb   :  { %282 = vmatprep.subr.bf16.mxu0 %v309_v7 }
   0xd   :  { %220 = vmatpush1.bf16.msra.mxu1 %v303_v27 }
   0xe   :  { %283 = vmatpush3.bf16.msra.mxu0 %v294_v11  ;;  %221 = vmatprep.subr.bf16.mxu1 %v304_v28 }
  0x11   :  { %222 = vmatpush1.bf16.msra.mxu1 %v306_v29 }
  0x8c   :  { %v33_v2 = vpop.xlane.xlu0 %32 }
  0x8d   :  { %v35_v3 = vmul.f32 0.015625, %v33_v2 }
  0x8f   :  { %v36_v4 = vsub.f32 %v27_v0, %v35_v3 }
  0x91   :  { %v37_v5 = vmul.f32 %v36_v4, %v36_v4 }
  0x93   :  { %v38_v6 = vsel %vm30_vm0, %v37_v5, 0.0 }
  0x94   :  { %39 = vadd.xlane.f32.xlu0 %v38_v6 }
 0x11d   :  { %v40_v17 = vpop.xlane.xlu0 %39 }
 0x11e   :  { %v41_v18 = vmul.f32 0.015625, %v40_v17 }
 0x120   :  { %v42_v19 = vadd.f32 1e-06, %v41_v18 }
 0x122   :  { %307 = vrsqrt.f32 %v42_v19 }
 0x12f   :  { %v308_v20 = vpop.eup %307 }
 0x130   :  { %v44_v22 = vmul.f32 %v308_v20, %v36_v4 }
 0x132   :  { %v51_v24 = vmul.f32 %v254_v21, %v44_v22 }
 0x134   :  { %v58_v25 = vadd.f32 %v255_v23, %v51_v24 }
 0x136   :  { %v59_v26 = vpack.c.bf16 %v58_v25, %v58_v25 }
 0x138   :  { %285 = vmatmul.mubr.msk.bf16.vlgmr.msra.gmra.mxu0 %vm30_vm0, %v59_v26 }
 0x1f8   :  { %v136_v32 = vpop.f32.mrf.mxu0 }
 0x1f9   :  { %v137_v33 = vadd.f32 %v256_v31, %v136_v32 }
 0x1fa   :  { %v286_v34 = vpop.f32.mrf.mxu0 }
 0x1fb   :  { %v142_v35 = vmax.f32 %v137_v33, 0.0 }
 0x1fc   :  { %v139_v36 = vpop.f32.mrf.mxu0 }
 0x1fd   :  { %v143_v37 = vpack.c.bf16 %v142_v35, %v142_v35 }
 0x1fe   :  { %v287_v38 = vpop.f32.mrf.mxu0 }
 0x1ff   :  { %270 = vmatmul.mubr.msk.bf16.vlgmr.msra.gmra.mxu1 %vm30_vm0, %v143_v37 }
 0x2bf   :  { %v241_v46 = vpop.f32.mrf.mxu1 }
 0x2c0   :  { %v242_v47 = vadd.f32 %v241_v46, %v157_v44 }
 0x2c1   :  { %v243_v48 = vpop.f32.mrf.mxu1 }
 0x2c2   :  { %248 = vst [vmem:[%s420_s7] sm:$0xff] %v242_v47  ;;  %v244_v49 = vadd.f32 %v243_v48, %v161_v45 }
 0x2c3   :  { %v245_v50 = vpop.f32.mrf.mxu1 }
 0x2c4   :  { %249 = vst [vmem:[%s420_s7 + $0x8] sm:$0xff] %v244_v49 }
 0x2c5   :  { %v246_v51 = vpop.f32.mrf.mxu1 }

// kernel: _lambda_.4
= control target key start
LH: loop header
LB: loop body
LE: loop exit
PB: predicated region body
PF: predicated region fallthrough
CT: control target
= control target key end

     0   :  { %s750_s27 = smov 0   ;;  %s844_s0 = inlined_call_operand.vmem [shape: f32[2,8,256], index: 0, kind: input, shape index: {}]   ;;  %s845_s1 = inlined_call_operand.vmem [shape: f32[2,8,1], index: 1, kind: input, shape index: {}]   ;;  %s846_s2 = inlined_call_operand.vmem [shape: bf16[256,64], index: 2, kind: input, shape index: {}]   ;;  %s847_s3 = inlined_call_operand.vmem [shape: f32[1,64], index: 3, kind: input, shape index: {}]   ;;  %s848_s4 = inlined_call_operand.vmem [shape: f32[1,64], index: 4, kind: input, shape index: {}]   ;;  %s849_s5 = inlined_call_operand.vmem [shape: f32[1,64], index: 5, kind: input, shape index: {}]   ;;  %s850_s6 = inlined_call_operand.vmem [shape: f32[1,64], index: 6, kind: input, shape index: {}]   ;;  %s851_s7 = inlined_call_operand.vmem [shape: f32[1,10,64], index: 7, kind: input, shape index: {}]   ;;  %s852_s8 = inlined_call_operand.vmem [shape: f32[2,10,64], index: 8, kind: output, shape index: {}]  }
   0x1 LB: > { %s615_s28 = sadd.s32 4294967295, %s702_s27   ;;  %p619_p0 = scmp.ge.s32.totalorder %s702_s27, 1  ;;  %s702_s27 = sphi %s750_s27, %s18_s27  }
   0x2   : > { %p271_p1 = scmp.lt.s32.totalorder %s702_s27, 3 }
   0x4   : > { %p272_p2 = pnand %p619_p0, %p271_p1 }
   0x5   : > { %p309_p3 = scmp.lt.s32.totalorder (!%p272_p2), %s615_s28, 1 }
   0x6   : > { %275 = sbr.rel (%p272_p2) target bundleno = 253 (0xfd), region = 52 }
   0xb   : > { %v680_v0 = vld [vmem:[%s846_s2 + $0x78] sm:$0xff]   ;;  %v682_v2 = vld [vmem:[%s846_s2 + $0x70] sm:$0xff]   ;;  %v704_v3 = vmov 0   ;;  %v684_v5 = vld [vmem:[%s846_s2 + $0x68] sm:$0xff]   ;;  %s854_s28 = smov (!%p309_p3, %s615_s28), 1  ;;  %vm536_vm0 = vcmask 1040384  }
   0xc   : > { %v681_v1 = vld [vmem:[%s846_s2 + $0x38] sm:$0xff]   ;;  %648 = vmatprep.subr.bf16.mxu0 %v680_v0  ;;  %679 = vset.pattern.permute.xlu0 %v704_v3  ;;  %v683_v4 = vld [vmem:[%s846_s2 + $0x30] sm:$0xff]   ;;  %v685_v6 = vld [vmem:[%s846_s2 + $0x28] sm:$0xff]   ;;  %s646_s21 = sshll.u32 %s854_s28, 4  ;;  %s622_s22 = sshll.u32 %s854_s28, 3  ;;  %vm538_vm1 = vcmask 1041408  }
   0xd   : > { %649 = vmatpush3.bf16.msra.mxu0 %v681_v1  ;;  %v686_v7 = vld [vmem:[%s846_s2 + $0x60] sm:$0xff]   ;;  %v688_v9 = vld [vmem:[%s846_s2 + $0x58] sm:$0xff]   ;;  %s313_s9 = scalar_lea.vmem %s844_s0, %s646_s21  ;;  %s317_s12 = scalar_lea.vmem %s845_s1, %s622_s22  ;;  %v690_v11 = vld [vmem:[%s846_s2 + $0x50] sm:$0xff]   ;;  %vm546_vm2 = vcmask 517120   ;;  %vm544_vm3 = vcmask 523264  }
   0xe   : > { %650 = vmatprep.subr.bf16.mxu0 %v682_v2  ;;  %v687_v8 = vld [vmem:[%s846_s2 + $0x20] sm:$0xff]   ;;  %v689_v10 = vld [vmem:[%s846_s2 + $0x18] sm:$0xff]   ;;  %v325_v12 = vld [vmem:[%s313_s9 + $0x8] sm:$0xff]  ;;  %s322_s23 = scalar_lea.vmem %s852_s8, %s646_s21 }
   0xf   : > { %v503_v13 = vld [vmem:[%s317_s12] sm:$0xff]  ;;  %v327_v14 = vpack.c.bf16 %v325_v12, %v325_v12  ;;  %v691_v16 = vld [vmem:[%s846_s2 + $0x10] sm:$0xff]   ;;  %v692_v17 = vld [vmem:[%s846_s2 + $0x48] sm:$0xff]  }
  0x10   : > { %506 = vperm.xlu0 %679, %v503_v13   ;;  %v510_v15 = vsub.f32 1.0, %v503_v13  ;;  %v693_v18 = vld [vmem:[%s846_s2 + $0x8] sm:$0xff]   ;;  %v694_v19 = vld [vmem:[%s846_s2 + $0x40] sm:$0xff]  }
  0x11   : > { %651 = vmatpush3.bf16.msra.mxu0 %v683_v4  ;;  %495 = vmatprep.mubr.bf16.mxu0 %v327_v14  ;;  %v695_v20 = vld [vmem:[%s846_s2] sm:$0xff]   ;;  %v541_v39 = vld [vmem:[%s851_s7 + $0x8] sm:$0x3] }
  0x12   : > { %652 = vmatprep.subr.bf16.mxu0 %v684_v5  ;;  %v324_v21 = vld [vmem:[%s313_s9] sm:$0xff] }
  0x13   : > { %v326_v22 = vpack.c.bf16 %v324_v21, %v324_v21  ;;  %v625_v25 = vld [vmem:[%s847_s3] ss:$0 sm:$0xff] }
  0x14   : > { %514 = vperm.xlu0 %679, %v510_v15   ;;  %v642_v28 = vld [vmem:[%s850_s6] ss:$0 sm:$0xff] }
  0x15   : > { %653 = vmatpush3.bf16.msra.mxu0 %v685_v6  ;;  %v525_v35 = vld [vmem:[%s848_s4] sm:$0x1] }
  0x16   : > { %654 = vmatprep.subr.bf16.mxu0 %v686_v7  ;;  %v643_v36 = vld [vmem:[%s849_s5] ss:$0 sm:$0xff] }
  0x17   : > { %v537_v38 = vsel %vm536_vm0, %v525_v35, %v643_v36  ;;  %v540_v41 = vld [vmem:[%s851_s7] sm:$0xff] }
  0x19   : > { %655 = vmatpush3.bf16.msra.mxu0 %v687_v8 }
  0x1a   : > { %656 = vmatprep.subr.bf16.mxu0 %v688_v9 }
  0x1d   : > { %657 = vmatpush3.bf16.msra.mxu0 %v689_v10 }
  0x1e   : > { %658 = vmatprep.subr.bf16.mxu0 %v690_v11 }
  0x21   : > { %659 = vmatpush3.bf16.msra.mxu0 %v691_v16 }
  0x22   : > { %660 = vmatprep.subr.bf16.mxu0 %v692_v17 }
  0x25   : > { %661 = vmatpush3.bf16.msra.mxu0 %v693_v18 }
  0x26   : > { %662 = vmatprep.subr.bf16.mxu0 %v694_v19 }
  0x29   : > { %663 = vmatpush3.bf16.msra.mxu0 %v695_v20 }
  0x2c   : > { %496 = vmatmul.mubr.bf16.vlgmr.msra.gmra.mxu0 %v326_v22 }
  0x8b   : > { %v507_v23 = vpop.permute.xlu0 %506 }
  0x8f   : > { %v515_v29 = vpop.permute.xlu0 %514 }
  0x90   : > { %v523_v33 = vmul.f32 %v642_v28, %v515_v29 }
  0xec   : > { %v664_v24 = vpop.f32.mrf.mxu0 }
  0xee   : > { %v665_v26 = vpop.f32.mrf.mxu0 }
  0xef   : > { %v666_v27 = vadd.f32 %v665_v26, %v664_v24 }
  0xf0   : > { %v667_v30 = vpop.f32.mrf.mxu0 }
  0xf1   : > { %v498_v31 = vadd.f32 %v666_v27, %v625_v25 }
  0xf2   : > { %v668_v32 = vpop.f32.mrf.mxu0 }
  0xf3   : > { %v509_v34 = vmul.f32 %v507_v23, %v498_v31 }
  0xf5   : > { %v524_v37 = vadd.f32 %v523_v33, %v509_v34 }
  0xf7   : > { %v534_v40 = vrot.slane %v524_v37, 6 }
  0xf9   : > { %v539_v42 = vsel %vm538_vm1, %v537_v38, %v534_v40  ;;  %v543_v43 = vadd.f32 %v541_v39, %v534_v40 }
  0xfa   : > { %v542_v44 = vadd.f32 %v540_v41, %v539_v42 }
  0xfb   : > { %547 = vst.msk [vmem:[%s322_s23 + $0x8] sm:$0x3] %vm546_vm2, %v543_v43 }
  0xfc   : > { %545 = vst.msk [vmem:[%s322_s23] sm:$0xff] %vm544_vm3, %v542_v44 }
  0xfd PF: > { %s18_s27 = sadd.s32 1, %s702_s27  }
  0xfe   : > { %p15_p4 = scmp.ge.s32.totalorder %s18_s27, 4  }
 0x100   :  { %17 = sbr.rel (!%p15_p4) target bundleno = 1 (0x1), region = 85 }

// kernel: _lambda_.7
= control target key start
LH: loop header
LB: loop body
LE: loop exit
PB: predicated region body
PF: predicated region fallthrough
CT: control target
= control target key end

     0   :  { %s115_s0 = inlined_call_operand.vmem [shape: f32[8,256], index: 0, kind: input, shape index: {}]   ;;  %s116_s1 = inlined_call_operand.vmem [shape: f32[8,256], index: 1, kind: input, shape index: {}]   ;;  %s117_s2 = inlined_call_operand.hbm [shape: f32[1,1], index: 2, kind: output, shape index: {}]  }
   0x1   :  { %v18_v0 = vld [vmem:[%s115_s0] sm:$0xff]  ;;  %v19_v1 = vld [vmem:[%s115_s0 + $0x8] sm:$0xff] }
   0x2   :  { %v20_v2 = vld [vmem:[%s116_s1] sm:$0xff]  ;;  %v21_v3 = vld [vmem:[%s116_s1 + $0x8] sm:$0xff] }
   0x3   :  { %v22_v4 = vsub.f32 %v18_v0, %v20_v2 }
   0x4   :  { %7 = vsyncpa [#allocation3], 0  ;;  %v23_v5 = vsub.f32 %v19_v1, %v21_v3  ;;  %vm16_vm0 = vcmask 0   ;;  %v81_v9 = vmov 0.0   ;;  %s82_s0 = smov [#allocation2]  }
   0x5   :  { %v25_v6 = vmul.f32 %v22_v4, %v22_v4  ;;  %17 = vst.msk [vmem:[#allocation2] sm:$0x1] %vm16_vm0, %v81_v9  ;;  %s47_s1 = sshll.u32 %s82_s0, 4  ;;  %s48_s1 = int_to_ptr.vmem [resolvable:$true] %s47_s1 }
   0x6   :  { %v26_v7 = vmul.f32 %v23_v5, %v23_v5  ;;  %s59_s18 = scalar_lea.vmem %s48_s1, 16  ;;  %s63_s19 = scalar_lea.vmem %s48_s1, 32 }
   0x7   :  { %p60_p0 = scmp.ne.s32.totalorder %s48_s1, %s59_s18  ;;  %p64_p1 = scmp.lt.s32.totalorder %s48_s1, %s48_s1 }
   0x8   :  { %v27_v8 = vadd.f32 %v26_v7, %v25_v6  ;;  %p65_p2 = scmp.lt.s32.totalorder %s63_s19, %s59_s18 }
   0xa   :  { %28 = vadd.xlane.f32.xlu0 %v27_v8  ;;  %p66_p3 = por %p65_p2, %p64_p1 }
   0xc   :  { %v24_v17 = vld [vmem:[#allocation2] sm:$0x1]  ;;  %p67_p4 = pnand %p66_p3, %p60_p0 }
  0x93   :  { %v29_v10 = vpop.xlane.xlu0 %28 }
  0x94   :  { %v30_v11 = vrot.slane %v29_v10, 4 }
  0x96   :  { %v31_v12 = vadd.f32 %v30_v11, %v29_v10 }
  0x98   :  { %v32_v13 = vrot.slane %v31_v12, 2 }
  0x9a   :  { %v33_v14 = vadd.f32 %v32_v13, %v31_v12 }
  0x9c   :  { %v34_v15 = vrot.slane %v33_v14, 1 }
  0x9e   :  { %v35_v16 = vadd.f32 %v34_v15, %v33_v14 }
  0xa0   :  { %55 = vpush %v35_v16 }
  0xd1   :  { %s56_s17 = spop %55 }
  0xd2   :  { %v37_v18 = vstv %s56_s17 }
  0xd3   :  { %v38_v19 = vadd.f32 %v37_v18, %v24_v17 }
  0xd5   :  { %40 = vst.msk [vmem:[#allocation2] sm:$0x1] %vm16_vm0, %v38_v19 }
  0xd6   :  { %70 = shalt.err (!%p67_p4)
}
  0xd7   :  { %50 = dma.vmem_to_hbm [thread:$0]  %s48_s1, 16, %s117_s2, [#allocation3]  }
  0xd8   :  { %79 = dma.done.wait [#allocation3], 16  }
  0xd9   :  { %80 = vsyncadd [#allocation3], 4294967280 }
  0xda   :  { %54 = vsyncpa [#allocation3], 1 }

// kernel: _lambda_.5
= control target key start
LH: loop header
LB: loop body
LE: loop exit
PB: predicated region body
PF: predicated region fallthrough
CT: control target
= control target key end

     0   :  { %s2454_s25 = smov 0   ;;  %s2456_s26 = smov 0   ;;  %s2787_s0 = inlined_call_operand.vmem [shape: f32[2,10,64], index: 0, kind: input, shape index: {}]   ;;  %s2788_s1 = inlined_call_operand.vmem [shape: f32[2,1,64], index: 1, kind: input, shape index: {}, may-alias: {1,7}]   ;;  %s2789_s2 = inlined_call_operand.vmem [shape: f32[2,1,64], index: 2, kind: input, shape index: {}, may-alias: {2,6,8,12}]   ;;  %s2790_s3 = inlined_call_operand.vmem [shape: bf16[2,64,192], index: 3, kind: input, shape index: {}]   ;;  %s2791_s4 = inlined_call_operand.vmem [shape: f32[2,1,192], index: 4, kind: input, shape index: {}]   ;;  %s2792_s5 = inlined_call_operand.vmem [shape: bf16[2,64,64], index: 5, kind: input, shape index: {}]   ;;  %s2793_s6 = inlined_call_operand.vmem [shape: f32[2,1,64], index: 6, kind: input, shape index: {}, may-alias: {2,6,8,12}]   ;;  %s2794_s7 = inlined_call_operand.vmem [shape: f32[2,1,64], index: 7, kind: input, shape index: {}, may-alias: {1,7}]   ;;  %s2795_s8 = inlined_call_operand.vmem [shape: f32[2,1,64], index: 8, kind: input, shape index: {}, may-alias: {2,6,8,12}]   ;;  %s2796_s9 = inlined_call_operand.vmem [shape: bf16[2,64,256], index: 9, kind: input, shape index: {}]   ;;  %s2797_s10 = inlined_call_operand.vmem [shape: f32[2,1,256], index: 10, kind: input, shape index: {}]   ;;  %s2798_s11 = inlined_call_operand.vmem [shape: bf16[2,256,64], index: 11, kind: input, shape index: {}]   ;;  %s2799_s12 = inlined_call_operand.vmem [shape: f32[2,1,64], index: 12, kind: input, shape index: {}, may-alias: {2,6,8,12}]   ;;  %s2800_s13 = inlined_call_operand.vmem [shape: f32[2,10,64], index: 13, kind: output, shape index: {}]  }
   0x1   :  { %2805 = sst [smem:[#allocation9_spill]] %s2787_s0  ;;  %s2458_s27 = smov 0  }
   0x2   :  { %2806 = sst [smem:[#allocation10_spill]] %s2789_s2  ;;  %s2460_s28 = smov 0  }
   0x3   :  { %2807 = sst [smem:[#allocation11_spill]] %s2790_s3  ;;  %s2462_s29 = smov 0  }
   0x4   :  { %2808 = sst [smem:[#allocation12_spill]] %s2791_s4 }
   0x5   :  { %2809 = sst [smem:[#allocation13_spill]] %s2800_s13 }
   0x6 LB: > { %2810 = sst [smem:[#allocation2_spill]] %s2356_s25  ;;  %s32_s30 = sadd.s32 1, %s2364_s27  ;;  %s2372_s29 = sphi %s2462_s29, %s23_s29   ;;  %s2368_s28 = sphi %s2460_s28, %s2834_s28   ;;  %s2364_s27 = sphi %s2458_s27, %s2833_s27   ;;  %s2360_s26 = sphi %s2456_s26, %s2832_s26   ;;  %s2356_s25 = sphi %s2454_s25, %s2831_s25  }
   0x7   : > { %2811 = sst [smem:[#allocation3_spill]] %s2364_s27  ;;  %s35_s14 = sadd.s32 1, %s2368_s28 }
   0x8   : > { %2812 = sst [smem:[#allocation4_spill]] %s2368_s28  ;;  %p33_p0 = scmp.ge.s32.totalorder %s32_s30, 2 }
   0x9   : > { %2813 = sst [smem:[#allocation5_spill]] %s2372_s29  ;;  %p1997_p1 = scmp.ge.s32.totalorder %s2372_s29, 1 }
   0xa   : > { %p505_p2 = scmp.lt.s32.totalorder %s2372_s29, 5  ;;  %s2836_s30 = smov (%p33_p0, %s32_s30), 0 }
   0xb   : > { %2814 = sst [smem:[#allocation6_spill]] %s2836_s30  ;;  %s2838_s14 = smov (!%p33_p0, %s35_s14), %s2368_s28 }
   0xc   : > { %p506_p3 = pnand %p1997_p1, %p505_p2  ;;  %p37_p4 = scmp.ge.s32.totalorder %s2838_s14, 2 }
   0xe   : > { %s2840_s14 = smov (%p37_p4, %s2838_s14), 0  ;;  %509 = sbr.rel (%p506_p3) target bundleno = 2535 (0x9e7), region = 72 }
   0xf   : > { %2815 = sst [smem:[#allocation7_spill]] %s2840_s14 }
  0x13   : > { %p595_p5 = scmp.lt.s32.totalorder %s2360_s26, 1  ;;  %p600_p6 = scmp.lt.s32.totalorder %s2356_s25, 1 }
  0x14   : > { %s2816_s0 = sld [smem:[#allocation9_spill]] }
  0x15   : > { %s2842_s26 = smov (!%p595_p5, %s2360_s26), 1  ;;  %s2818_s3 = sld [smem:[#allocation11_spill]] }
  0x16   : > { %s2488_s15 = scalar_select %p600_p6, %s2356_s25, 1 }
  0x17   : > { %s2068_s16 = sshll.u32 %s2842_s26, 4  ;;  %s2819_s4 = sld [smem:[#allocation12_spill]] }
  0x18   : > { %s2069_s30 = sshll.u32 %s2488_s15, 6  ;;  %s2002_s26 = sshll.u32 %s2488_s15, 1 }
  0x19   : > { %s2070_s18 = sshll.u32 %s2488_s15, 5  ;;  %s2539_s20 = scalar_lea.vmem %s2797_s10, %s2002_s26 }
  0x1a   : > { %s599_s19 = scalar_lea.vmem %s2816_s0, %s2068_s16  ;;  %s2517_s21 = scalar_lea.vmem %s2792_s5, %s2070_s18 }
  0x1b   : > { %s2505_s29 = scalar_lea.vmem %s2818_s3, %s2069_s30  ;;  %s2072_s23 = sshll.u32 %s2488_s15, 7 }
  0x1c   : > { %s645_s22 = scalar_lea.vmem %s2799_s12, %s2488_s15  ;;  %s2549_s2 = scalar_lea.vmem %s2798_s11, %s2072_s23 }
  0x1d   : > { %s2511_s17 = scalar_lea.vmem %s2819_s4, %s2002_s26  ;;  %s2821_s4 = sld [smem:[#allocation13_spill]] }
  0x1e   : > { %2820 = sst [smem:[#allocation8_spill]] %s2511_s17  ;;  %s2534_s17 = scalar_lea.vmem %s2796_s9, %s2069_s30 }
  0x1f   : > { %s2822_s25 = sld [smem:[#allocation2_spill]] }
  0x23   : > { %s2554_s30 = scalar_lea.vmem %s2821_s4, %s2068_s16 }
  0x25   : > { %p2012_p7 = scmp.ne.s32.totalorder %s2822_s25, 0 }
  0x27   : > { %655 = sbr.rel (%p2012_p7) target bundleno = 47 (0x2f), region = 76 }
  0x2c   : > { %v656_v0 = vld [vmem:[%s599_s19] sm:$0xff]  ;;  %vm658_vm0 = vcmask 523264   ;;  %v657_v1 = vld [vmem:[%s599_s19 + $0x8] sm:$0x3]  ;;  %vm660_vm1 = vcmask 517120  }
  0x2d   : > { %659 = vst.msk [vmem:[%s2554_s30] sm:$0xff] %vm658_vm0, %v656_v0 }
  0x2e   : > { %661 = vst.msk [vmem:[%s2554_s30 + $0x8] sm:$0x3] %vm660_vm1, %v657_v1 }
  0x2f PF: > { %vm666_vm2 = vcmask 523264   ;;  %vm670_vm3 = vcmask 517120   ;;  %v2242_v16 = vld [vmem:[%s2505_s29 + $0x34] ss:$8 sps:$4 sm:$0xff]   ;;  %v2244_v17 = vld [vmem:[%s2505_s29 + $0x30] ss:$8 sps:$4 sm:$0xff]   ;;  %s2823_s19 = scalar_lea.vmem %s2788_s1, %s2488_s15  ;;  %v722_v42 = vlaneseq  ;;  %s2827_s16 = scalar_lea.vmem %s2793_s6, %s2488_s15 }
  0x30   : > { %v2245_v18 = vld [vmem:[%s2505_s29 + $0x24] ss:$8 sps:$4 sm:$0xff]   ;;  %783 = vmatprep.subr.bf16.mxu1 %v2242_v16  ;;  %v2247_v19 = vld [vmem:[%s2505_s29 + $0x20] ss:$8 sps:$4 sm:$0xff]   ;;  %v2374_v20 = vmov 0   ;;  %s2824_s26 = sld [smem:[#allocation8_spill]] }
  0x31   : > { %784 = vmatpush1.bf16.msra.mxu1 %v2244_v17  ;;  %807 = vmatprep.mubr.bf16.mxu1 %v2374_v20  ;;  %v2248_v21 = vld [vmem:[%s2505_s29 + $0x14] ss:$8 sps:$4 sm:$0xff]   ;;  %v2250_v22 = vld [vmem:[%s2505_s29 + $0x10] ss:$8 sps:$4 sm:$0xff]   ;;  %v2251_v23 = vld [vmem:[%s2505_s29 + $0x4] ss:$8 sps:$4 sm:$0xff]  }
  0x32   : > { %785 = vmatprep.subr.bf16.mxu1 %v2245_v18  ;;  %v2253_v24 = vld [vmem:[%s2505_s29] ss:$8 sps:$4 sm:$0xff]   ;;  %s2825_s13 = sld [smem:[#allocation10_spill]]  ;;  %v2593_v43 = vshrl.u32 %v722_v42, 7  ;;  %v2375_v44 = vmov 0.0   ;;  %vm2376_vm4 = vmmov 0  }
  0x33   : > { %v2013_v33 = vld [vmem:[%s2823_s19] ss:$0 sm:$0xff]  ;;  %2129 = vmatprep.subr.bf16.mxu0 %v2375_v44  ;;  %2131 = vmatprep.mubr.msk.bf16.mxu0 %vm2376_vm4, %v2375_v44  ;;  %s2377_s18 = smov 48   ;;  %s2378_s23 = smov 64   ;;  %vm823_vm5 = vcmask 130048   ;;  %vm899_vm6 = vcmask 1044480  }
  0x34   : > { %v2560_v2 = vld [vmem:[%s2554_s30] sm:$0xff]  ;;  %v724_v45 = vsub.s32 0, %v2593_v43  ;;  %s2379_s24 = smov 112   ;;  %s2380_s27 = smov 96   ;;  %v728_v54 = vsub.s32 1, %v2593_v43  ;;  %vm871_vm7 = vcmask 80896  }
  0x35   : > { %v2563_v3 = vld [vmem:[%s2554_s30 + $0x8] sm:$0x3]  ;;  %v667_v4 = vsel %vm666_vm2, %v2560_v2, 0.0  ;;  %786 = vmatpush1.bf16.msra.mxu1 %v2247_v19  ;;  %s2381_s3 = smov 32   ;;  %s2382_s4 = smov 80   ;;  %vm875_vm8 = vcmask 74752  }
  0x36   : > { %668 = vadd.xlane.f32.xlu0 %v667_v4  ;;  %v671_v5 = vsel %vm670_vm3, %v2563_v3, 0.0  ;;  %787 = vmatprep.subr.bf16.mxu1 %v2248_v21  ;;  %v720_v46 = vld [vmem:[%s2824_s26] sm:$0x3]  ;;  %s2383_s25 = smov 16   ;;  %vm1340_vm9 = vcmask 261120   ;;  %vm1343_vm10 = vcmask 392192  }
  0x37   : > { %v725_v48 = vrot.slane %v720_v46, %v724_v45  ;;  %v729_v56 = vrot.slane %v720_v46, %v728_v54 }
  0x38   : > { %s2826_s0 = scalar_lea.vmem %s2825_s13, %s2488_s15  ;;  %s2829_s13 = scalar_lea.vmem %s2795_s8, %s2488_s15 }
  0x39   : > { %788 = vmatpush1.bf16.msra.mxu1 %v2250_v22  ;;  %v2014_v37 = vld [vmem:[%s2826_s0] ss:$0 sm:$0xff] }
  0x3a   : > { %672 = vadd.xlane.f32.xlu0 %v671_v5  ;;  %789 = vmatprep.subr.bf16.mxu1 %v2251_v23 }
  0x3d   : > { %790 = vmatpush1.bf16.msra.mxu1 %v2253_v24 }
  0x3e   : > { %2117 = vmatprep.subr.bf16.mxu1 %v2375_v44 }
  0xbf   : > { %v669_v6 = vpop.xlane.xlu0 %668 }
  0xc0   : > { %v675_v7 = vmul.f32 0.015625, %v669_v6 }
  0xc2   : > { %v677_v8 = vsub.f32 %v2560_v2, %v675_v7 }
  0xc3   : > { %v673_v9 = vpop.xlane.xlu0 %672 }
  0xc4   : > { %v676_v10 = vmul.f32 0.015625, %v673_v9  ;;  %v679_v11 = vmul.f32 %v677_v8, %v677_v8 }
  0xc6   : > { %v678_v12 = vsub.f32 %v2563_v3, %v676_v10  ;;  %v681_v13 = vsel %vm666_vm2, %v679_v11, 0.0 }
  0xc7   : > { %682 = vadd.xlane.f32.xlu1 %v681_v13 }
  0xc8   : > { %v680_v14 = vmul.f32 %v678_v12, %v678_v12 }
  0xca   : > { %v684_v15 = vsel %vm670_vm3, %v680_v14, 0.0 }
  0xcb   : > { %685 = vadd.xlane.f32.xlu1 %v684_v15 }
 0x150   : > { %v683_v25 = vpop.xlane.xlu1 %682 }
 0x151   : > { %v687_v26 = vmul.f32 0.015625, %v683_v25 }
 0x153   : > { %v689_v27 = vadd.f32 1e-06, %v687_v26 }
 0x154   : > { %v686_v28 = vpop.xlane.xlu1 %685 }
 0x155   : > { %2286 = vrsqrt.f32 %v689_v27  ;;  %v688_v29 = vmul.f32 0.015625, %v686_v28 }
 0x157   : > { %v690_v30 = vadd.f32 1e-06, %v688_v29 }
 0x159   : > { %2288 = vrsqrt.f32 %v690_v30 }
 0x162   : > { %v2287_v31 = vpop.eup %2286 }
 0x163   : > { %v693_v32 = vmul.f32 %v2287_v31, %v677_v8 }
 0x165   : > { %v701_v36 = vmul.f32 %v2013_v33, %v693_v32 }
 0x166   : > { %v2289_v34 = vpop.eup %2288 }
 0x167   : > { %v694_v35 = vmul.f32 %v2289_v34, %v678_v12  ;;  %v709_v39 = vadd.f32 %v2014_v37, %v701_v36 }
 0x169   : > { %v702_v38 = vmul.f32 %v2013_v33, %v694_v35 }
 0x16b   : > { %v710_v40 = vadd.f32 %v2014_v37, %v702_v38 }
 0x16d   : > { %v711_v41 = vpack.c.bf16 %v710_v40, %v709_v39 }
 0x16f   : > { %2023 = vmatmul.mubr.msk.bf16.vlgmr.msra.gmra.mxu1 %vm666_vm2, %v711_v41 }
 0x170   : > { %2119 = vmatprep.mubr.msk.bf16.mxu1 %vm2376_vm4, %v2375_v44 }
 0x22f   : > { %v809_v47 = vpop.f32.mrf.mxu1 }
 0x230   : > { %v810_v51 = vadd.f32 %v809_v47, %v725_v48 }
 0x231   : > { %v811_v49 = vpop.f32.mrf.mxu1 }
 0x232   : > { %v812_v62 = vadd.f32 %v811_v49, %v729_v56 }
 0x233   : > { %v813_v50 = vpop.f32.mrf.mxu1 }
 0x234   : > { %v814_v52 = vadd.f32 %v813_v50, %v725_v48 }
 0x235   : > { %v815_v55 = vpop.f32.mrf.mxu1 }
 0x236   : > { %v818_v53 = vpack.c.bf16 %v814_v52, %v810_v51  ;;  %v816_v59 = vadd.f32 %v815_v55, %v729_v56 }
 0x238   : > { %946 = vrot.lane.b32.xlu1 %v818_v53, %s2377_s18  ;;  %821 = vrot.lane.b32.xlu0 %v818_v53, %s2378_s23  ;;  %v2618_v0 = vpack.c.bf16 %v816_v59, %v812_v62 }
 0x23a   : > { %v901_v5 = vsel %vm899_vm6, %v2618_v0, 0 }
 0x23c   : > { %944 = vrot.lane.b32.xlu1 %v818_v53, %s2379_s24  ;;  %1068 = vrot.lane.b32.xlu0 %v818_v53, %s2380_s27 }
 0x240   : > { %1070 = vrot.lane.b32.xlu1 %v818_v53, %s2381_s3  ;;  %1191 = vrot.lane.b32.xlu0 %v818_v53, %s2382_s4 }
 0x244   : > { %1193 = vrot.lane.b32.xlu1 %v818_v53, %s2383_s25 }
 0x2aa   : > { %v947_v57 = vpop.permute.xlu1 %946  ;;  %v822_v58 = vpop.permute.xlu0 %821 }
 0x2ab   : > { %v828_v60 = vsel %vm823_vm5, %v822_v58, 0  ;;  %v952_v61 = vsel %vm823_vm5, %v947_v57, 0 }
 0x2ac   : > { %2118 = vmatpush3.bf16.xpose.msra.mxu1 %v828_v60  ;;  %2130 = vmatpush3.bf16.xpose.msra.mxu0 %v952_v61 }
 0x2ad   : > { %2123 = vmatprep.subr.bf16.mxu1 %v2375_v44  ;;  %2141 = vmatprep.subr.bf16.mxu0 %v2375_v44 }
 0x2ae   : > { %v945_v63 = vpop.permute.xlu1 %944  ;;  %v1069_v7 = vpop.permute.xlu0 %1068 }
 0x2b2   : > { %v1071_v1 = vpop.permute.xlu1 %1070  ;;  %v1192_v9 = vpop.permute.xlu0 %1191 }
 0x2b3   : > { %v1076_v4 = vsel %vm823_vm5, %v1071_v1, 0  ;;  %2120 = vmatmul.mubr.msk.bf16.vlgmr.msra.gmra.mxu1 %vm823_vm5, %v818_v53  ;;  %2132 = vmatmul.mubr.msk.bf16.vlgmr.msra.gmra.mxu0 %vm823_vm5, %v945_v63 }
 0x2b4   : > { %2124 = vmatpush3.bf16.msra.mxu1 %v901_v5  ;;  %2142 = vmatpush3.bf16.xpose.msra.mxu0 %v1076_v4 }
 0x2b5   : > { %2143 = vmatprep.mubr.msk.bf16.mxu0 %vm2376_vm4, %v2375_v44  ;;  %2153 = vmatprep.subr.bf16.mxu0 %v2375_v44 }
 0x2b6   : > { %2125 = vmatprep.mubr.msk.bf16.mxu1 %vm2376_vm4, %v2375_v44  ;;  %2135 = vmatprep.subr.bf16.mxu1 %v2375_v44  ;;  %v1194_v6 = vpop.permute.xlu1 %1193 }
 0x2b7   : > { %v1199_v8 = vsel %vm823_vm5, %v1194_v6, 0 }
 0x2bb   : > { %2144 = vmatmul.mubr.msk.bf16.vlgmr.msra.gmra.mxu0 %vm823_vm5, %v1069_v7 }
 0x2bc   : > { %2154 = vmatpush3.bf16.xpose.msra.mxu0 %v1199_v8  ;;  %2155 = vmatprep.mubr.msk.bf16.mxu0 %vm2376_vm4, %v2375_v44 }
 0x2bd   : > { %2165 = vmatprep.subr.bf16.mxu0 %v2375_v44 }
 0x2c3   : > { %2156 = vmatmul.mubr.msk.bf16.vlgmr.msra.gmra.mxu0 %vm823_vm5, %v1192_v9 }
 0x2c4   : > { %2173 = vmatprep.mubr.msk.bf16.mxu0 %vm2376_vm4, %v2375_v44 }
 0x373   : > { %v864_v10 = vpop.f32.mrf.mxu1  ;;  %v2639_v11 = vpop.f32.mrf.mxu0 }
 0x374   : > { %v872_v12 = vsel %vm871_vm7, %v864_v10, -inf  ;;  %v995_v22 = vsel %vm871_vm7, %v2639_v11, -inf }
 0x375   : > { %v2133_v13 = vpop.f32.mrf.mxu0  ;;  %873 = vmax.xlane.f32.xlu1 %v872_v12  ;;  %v2121_v14 = vpop.f32.mrf.mxu1 }
 0x377   : > { %v867_v15 = vpop.f32.mrf.mxu1  ;;  %v991_v16 = vpop.f32.mrf.mxu0 }
 0x378   : > { %v876_v17 = vsel %vm875_vm8, %v867_v15, -inf  ;;  %v998_v26 = vsel %vm875_vm8, %v991_v16, -inf }
 0x379   : > { %v2134_v18 = vpop.f32.mrf.mxu0  ;;  %877 = vmax.xlane.f32.xlu0 %v876_v17  ;;  %v2122_v19 = vpop.f32.mrf.mxu1 }
 0x37b   : > { %v1112_v21 = vpop.f32.mrf.mxu0 }
 0x37c   : > { %v1119_v23 = vsel %vm871_vm7, %v1112_v21, -inf }
 0x37d   : > { %996 = vmax.xlane.f32.xlu0 %v995_v22  ;;  %1120 = vmax.xlane.f32.xlu1 %v1119_v23  ;;  %v2145_v24 = vpop.f32.mrf.mxu0 }
 0x37f   : > { %v1115_v25 = vpop.f32.mrf.mxu0 }
 0x380   : > { %v1122_v29 = vsel %vm875_vm8, %v1115_v25, -inf }
 0x381   : > { %999 = vmax.xlane.f32.xlu0 %v998_v26  ;;  %v2146_v27 = vpop.f32.mrf.mxu0 }
 0x383   : > { %v1235_v28 = vpop.f32.mrf.mxu0 }
 0x384   : > { %v1242_v30 = vsel %vm871_vm7, %v1235_v28, -inf }
 0x385   : > { %1123 = vmax.xlane.f32.xlu0 %v1122_v29  ;;  %1243 = vmax.xlane.f32.xlu1 %v1242_v30  ;;  %v2157_v31 = vpop.f32.mrf.mxu0 }
 0x387   : > { %v1238_v32 = vpop.f32.mrf.mxu0 }
 0x388   : > { %v1245_v33 = vsel %vm875_vm8, %v1238_v32, -inf }
 0x389   : > { %1246 = vmax.xlane.f32.xlu0 %v1245_v33  ;;  %v2158_v34 = vpop.f32.mrf.mxu0 }
 0x3fe   : > { %v874_v35 = vpop.xlane.xlu1 %873 }
 0x3ff   : > { %v879_v36 = vsub.f32 %v864_v10, %v874_v35 }
 0x401   : > { %v881_v37 = vmul.f32 1.442695, %v879_v36 }
 0x402   : > { %v878_v38 = vpop.xlane.xlu0 %877 }
 0x403   : > { %2290 = vpow2.f32 %v881_v37  ;;  %v880_v39 = vsub.f32 %v867_v15, %v878_v38 }
 0x405   : > { %v883_v40 = vmul.f32 1.442695, %v880_v39 }
 0x406   : > { %v997_v41 = vpop.xlane.xlu0 %996  ;;  %v1121_v5 = vpop.xlane.xlu1 %1120 }
 0x407   : > { %2292 = vpow2.f32 %v883_v40  ;;  %v1001_v4 = vsub.f32 %v2639_v11, %v997_v41  ;;  %v1125_v6 = vsub.f32 %v1112_v21, %v1121_v5  ;;  %v2256_v5 = vld [vmem:[%s2517_s21 + $0x8] sm:$0xff]  }
 0x409   : > { %v1003_v7 = vmul.f32 1.442695, %v1001_v4  ;;  %v1127_v9 = vmul.f32 1.442695, %v1125_v6 }
 0x40a   : > { %v1000_v42 = vpop.xlane.xlu0 %999 }
 0x40b   : > { %v1002_v46 = vsub.f32 %v991_v16, %v1000_v42 }
 0x40d   : > { %v1005_v47 = vmul.f32 1.442695, %v1002_v46 }
 0x40e   : > { %v1124_v48 = vpop.xlane.xlu0 %1123  ;;  %v1244_v8 = vpop.xlane.xlu1 %1243 }
 0x40f   : > { %2294 = vpow2.f32 %v1005_v47  ;;  %v1126_v49 = vsub.f32 %v1115_v25, %v1124_v48  ;;  %v1248_v10 = vsub.f32 %v1235_v28, %v1244_v8  ;;  %v2257_v8 = vld [vmem:[%s2517_s21] sm:$0xff]  }
 0x410   : > { %v2291_v50 = vpop.eup %2290 }
 0x411   : > { %v1129_v51 = vmul.f32 1.442695, %v1126_v49  ;;  %v885_v52 = vsel %vm871_vm7, %v2291_v50, 0.0  ;;  %v1250_v12 = vmul.f32 1.442695, %v1248_v10 }
 0x412   : > { %886 = vadd.xlane.f32.xlu1 %v885_v52  ;;  %v1247_v53 = vpop.xlane.xlu0 %1246 }
 0x413   : > { %v1249_v55 = vsub.f32 %v1238_v32, %v1247_v53  ;;  %2296 = vpow2.f32 %v1129_v51 }
 0x414   : > { %v2293_v56 = vpop.eup %2292 }
 0x415   : > { %v1252_v57 = vmul.f32 1.442695, %v1249_v55  ;;  %v888_v58 = vsel %vm875_vm8, %v2293_v56, 0.0 }
 0x416   : > { %889 = vadd.xlane.f32.xlu0 %v888_v58 }
 0x417   : > { %2298 = vpow2.f32 %v1252_v57 }
 0x418   : > { %2300 = vpow2.f32 %v1003_v7 }
 0x419   : > { %2302 = vpow2.f32 %v1127_v9 }
 0x41a   : > { %2304 = vpow2.f32 %v1250_v12 }
 0x41c   : > { %v2295_v59 = vpop.eup %2294 }
 0x41d   : > { %v1010_v60 = vsel %vm875_vm8, %v2295_v59, 0.0 }
 0x41e   : > { %1011 = vadd.xlane.f32.xlu0 %v1010_v60  ;;  %v2254_v60 = vld [vmem:[%s2517_s21 + $0x18] sm:$0xff]  }
 0x41f   : > { %2166 = vmatpush3.bf16.msra.mxu0 %v2254_v60  ;;  %v2264_v60 = vld [vmem:[%s2534_s17 + $0x10] ss:$8 sps:$4 sm:$0xff]  }
 0x420   : > { %v2653_v61 = vpop.eup %2296  ;;  %2167 = vmatprep.subr.bf16.mxu0 %v2375_v44 }
 0x421   : > { %v1134_v62 = vsel %vm875_vm8, %v2653_v61, 0.0 }
 0x422   : > { %1135 = vadd.xlane.f32.xlu0 %v1134_v62 }
 0x423   : > { %1019 = vrot.lane.b32.xlu1 %v2618_v0, %s2379_s24 }
 0x424   : > { %v2659_v63 = vpop.eup %2298 }
 0x425   : > { %v1257_v1 = vsel %vm875_vm8, %v2659_v63, 0.0  ;;  %v2301_v13 = vpop.eup %2300 }
 0x426   : > { %1258 = vadd.xlane.f32.xlu0 %v1257_v1  ;;  %v1007_v14 = vsel %vm871_vm7, %v2301_v13, 0.0  ;;  %v2303_v15 = vpop.eup %2302  ;;  %v2255_v1 = vld [vmem:[%s2517_s21 + $0x10] sm:$0xff]  }
 0x427   : > { %v1131_v11 = vsel %vm871_vm7, %v2303_v15, 0.0  ;;  %v2305_v16 = vpop.eup %2304  ;;  %2168 = vmatpush3.bf16.msra.mxu0 %v2255_v1 }
 0x428   : > { %v1254_v17 = vsel %vm871_vm7, %v2305_v16, 0.0  ;;  %2169 = vmatprep.subr.bf16.mxu0 %v2375_v44 }
 0x42b   : > { %2170 = vmatpush3.bf16.msra.mxu0 %v2256_v5 }
 0x42c   : > { %2171 = vmatprep.subr.bf16.mxu0 %v2375_v44 }
 0x42f   : > { %2172 = vmatpush3.bf16.msra.mxu0 %v2257_v8 }
 0x43c   : > { %1142 = vrot.lane.b32.xlu0 %v2618_v0, %s2380_s27 }
 0x447   : > { %1008 = vadd.xlane.f32.xlu1 %v1007_v14 }
 0x44b   : > { %1132 = vadd.xlane.f32.xlu1 %v1131_v11 }
 0x44f   : > { %1255 = vadd.xlane.f32.xlu1 %v1254_v17 }
 0x460   : > { %1265 = vrot.lane.b32.xlu1 %v2618_v0, %s2382_s4 }
 0x49b   : > { %v887_v18 = vpop.xlane.xlu1 %886 }
 0x49c   : > { %2306 = vrcp.f32 %v887_v18 }
 0x49f   : > { %v890_v19 = vpop.xlane.xlu0 %889  ;;  %v1020_v25 = vpop.permute.xlu1 %1019 }
 0x4a0   : > { %2308 = vrcp.f32 %v890_v19  ;;  %v1025_v27 = vsel %vm899_vm6, %v1020_v25, 0 }
 0x4a7   : > { %v1012_v0 = vpop.xlane.xlu0 %1011 }
 0x4a8   : > { %2310 = vrcp.f32 %v1012_v0 }
 0x4a9   : > { %v2307_v21 = vpop.eup %2306 }
 0x4aa   : > { %v893_v23 = vmul.f32 %v2307_v21, %v2291_v50 }
 0x4ab   : > { %v1136_v29 = vpop.xlane.xlu0 %1135 }
 0x4ad   : > { %v2309_v22 = vpop.eup %2308 }
 0x4ae   : > { %v894_v24 = vmul.f32 %v2309_v22, %v2293_v56 }
 0x4af   : > { %v1259_v31 = vpop.xlane.xlu0 %1258 }
 0x4b0   : > { %v895_v26 = vpack.c.bf16 %v894_v24, %v893_v23 }
 0x4b2   : > { %2126 = vmatmul.mubr.msk.bf16.vlgmr.msra.gmra.mxu1 %vm871_vm7, %v895_v26 }
 0x4b3   : > { %2136 = vmatpush3.bf16.msra.mxu1 %v1025_v27  ;;  %2137 = vmatprep.mubr.msk.bf16.mxu1 %vm2376_vm4, %v2375_v44  ;;  %v1143_v37 = vpop.permute.xlu0 %1142 }
 0x4b4   : > { %2147 = vmatprep.subr.bf16.mxu1 %v2375_v44  ;;  %v1148_v40 = vsel %vm899_vm6, %v1143_v37, 0 }
 0x4b5   : > { %v2311_v33 = vpop.eup %2310 }
 0x4b6   : > { %v1016_v36 = vmul.f32 %v2311_v33, %v2295_v59 }
 0x4d0   : > { %v1009_v28 = vpop.xlane.xlu1 %1008 }
 0x4d1   : > { %2312 = vrcp.f32 %v1009_v28 }
 0x4d4   : > { %v1133_v30 = vpop.xlane.xlu1 %1132 }
 0x4d5   : > { %2314 = vrcp.f32 %v1133_v30 }
 0x4d6   : > { %2316 = vrcp.f32 %v1136_v29 }
 0x4d8   : > { %v1256_v32 = vpop.xlane.xlu1 %1255 }
 0x4d9   : > { %2318 = vrcp.f32 %v1256_v32  ;;  %v2032_v32 = vld [vmem:[%s2827_s16] ss:$0 sm:$0xff] }
 0x4da   : > { %2320 = vrcp.f32 %v1259_v31 }
 0x4dc   : > { %v1266_v47 = vpop.permute.xlu1 %1265 }
 0x4dd   : > { %v1271_v50 = vsel %vm899_vm6, %v1266_v47, 0 }
 0x4de   : > { %v2313_v34 = vpop.eup %2312 }
 0x4df   : > { %v1015_v35 = vmul.f32 %v2313_v34, %v2301_v13 }
 0x4e1   : > { %v1017_v38 = vpack.c.bf16 %v1016_v36, %v1015_v35 }
 0x4e2   : > { %v2315_v39 = vpop.eup %2314 }
 0x4e3   : > { %2138 = vmatmul.mubr.msk.bf16.vlgmr.msra.gmra.mxu1 %vm871_vm7, %v1017_v38  ;;  %v2317_v41 = vpop.eup %2316  ;;  %v1139_v42 = vmul.f32 %v2315_v39, %v2303_v15 }
 0x4e4   : > { %2148 = vmatpush3.bf16.msra.mxu1 %v1148_v40  ;;  %2149 = vmatprep.mubr.msk.bf16.mxu1 %vm2376_vm4, %v2375_v44  ;;  %v1140_v46 = vmul.f32 %v2317_v41, %v2653_v61 }
 0x4e5   : > { %2159 = vmatprep.subr.bf16.mxu1 %v2375_v44 }
 0x4e6   : > { %v1141_v48 = vpack.c.bf16 %v1140_v46, %v1139_v42  ;;  %v2319_v49 = vpop.eup %2318 }
 0x4e7   : > { %v2321_v51 = vpop.eup %2320  ;;  %v1262_v52 = vmul.f32 %v2319_v49, %v2305_v16 }
 0x4e8   : > { %v1263_v53 = vmul.f32 %v2321_v51, %v2659_v63 }
 0x4ea   : > { %v1264_v55 = vpack.c.bf16 %v1263_v53, %v1262_v52 }
 0x4eb   : > { %2150 = vmatmul.mubr.msk.bf16.vlgmr.msra.gmra.mxu1 %vm871_vm7, %v1141_v48 }
 0x4ec   : > { %2160 = vmatpush3.bf16.msra.mxu1 %v1271_v50  ;;  %2161 = vmatprep.mubr.msk.bf16.mxu1 %vm2376_vm4, %v2375_v44 }
 0x4f3   : > { %2162 = vmatmul.mubr.msk.bf16.vlgmr.msra.gmra.mxu1 %vm871_vm7, %v1264_v55  ;;  %v2260_v55 = vld [vmem:[%s2534_s17 + $0x34] ss:$8 sps:$4 sm:$0xff]  }
 0x4f4   : > { %1572 = vmatprep.mubr.bf16.mxu1 %v2374_v20  ;;  %1548 = vmatprep.subr.bf16.mxu1 %v2260_v55 }
 0x572   : > { %v937_v56 = vpop.f32.mrf.mxu1 }
 0x574   : > { %v2127_v57 = vpop.f32.mrf.mxu1 }
 0x575   : > { %v2263_v57 = vld [vmem:[%s2534_s17 + $0x24] ss:$8 sps:$4 sm:$0xff]  }
 0x576   : > { %v940_v58 = vpop.f32.mrf.mxu1 }
 0x578   : > { %v2128_v59 = vpop.f32.mrf.mxu1 }
 0x579   : > { %v2266_v59 = vld [vmem:[%s2534_s17 + $0x14] ss:$8 sps:$4 sm:$0xff]  }
 0x5a3   : > { %v1061_v61 = vpop.f32.mrf.mxu1 }
 0x5a5   : > { %v2139_v62 = vpop.f32.mrf.mxu1 }
 0x5a6   : > { %v2267_v62 = vld [vmem:[%s2534_s17] ss:$8 sps:$4 sm:$0xff]  }
 0x5a7   : > { %v1064_v4 = vpop.f32.mrf.mxu1 }
 0x5a8   : > { %v2227_v63 = vpack.i.bf16 %v1064_v4, %v1061_v61  ;;  %v2269_v61 = vld [vmem:[%s2534_s17 + $0x4] ss:$8 sps:$4 sm:$0xff]  }
 0x5a9   : > { %v2140_v6 = vpop.f32.mrf.mxu1 }
 0x5aa   : > { %2228 = vrot.lane.b32.xlu1 %v2227_v63, %s2383_s25 }
 0x5ab   : > { %v1184_v20 = vpop.f32.mrf.mxu1 }
 0x5ad   : > { %v2151_v7 = vpop.f32.mrf.mxu1 }
 0x5af   : > { %v1187_v9 = vpop.f32.mrf.mxu1 }
 0x5b0   : > { %v2232_v10 = vpack.i.bf16 %v1187_v9, %v1184_v20 }
 0x5b1   : > { %v2152_v12 = vpop.f32.mrf.mxu1 }
 0x5b2   : > { %2233 = vrot.lane.b32.xlu1 %v2232_v10, %s2381_s3 }
 0x5b3   : > { %v1307_v13 = vpop.f32.mrf.mxu1 }
 0x5b5   : > { %v2163_v14 = vpop.f32.mrf.mxu1 }
 0x5b6   : > { %v2039_v14 = vld [vmem:[%s2829_s13] ss:$0 sm:$0xff] }
 0x5b7   : > { %v1310_v15 = vpop.f32.mrf.mxu1 }
 0x5b8   : > { %v2237_v11 = vpack.i.bf16 %v1310_v15, %v1307_v13 }
 0x5b9   : > { %v2164_v16 = vpop.f32.mrf.mxu1 }
 0x5ba   : > { %2238 = vrot.lane.b32.xlu0 %v2237_v11, %s2377_s18 }
 0x61c   : > { %v2229_v17 = vpop.permute.xlu1 %2228 }
 0x61d   : > { %v2231_v19 = vunpack.i.h.bf16 %v2229_v17  ;;  %v2230_v21 = vunpack.i.l.bf16 %v2229_v17 }
 0x61f   : > { %v1339_v24 = vsel %vm823_vm5, %v940_v58, %v2231_v19  ;;  %v1338_v25 = vsel %vm823_vm5, %v937_v56, %v2230_v21  ;;  %v2258_v56 = vld [vmem:[%s2534_s17 + $0x30] ss:$8 sps:$4 sm:$0xff]   ;;  %v2261_v58 = vld [vmem:[%s2534_s17 + $0x20] ss:$8 sps:$4 sm:$0xff]   ;;  %s2828_s17 = scalar_lea.vmem %s2794_s7, %s2488_s15 }
 0x620   : > { %1549 = vmatpush1.bf16.msra.mxu1 %v2258_v56  ;;  %v2038_v9 = vld [vmem:[%s2828_s17] ss:$0 sm:$0xff]  ;;  %v2271_v19 = vld [vmem:[%s2549_s2 + $0x38] sm:$0xff]   ;;  %v2272_v21 = vld [vmem:[%s2549_s2 + $0x70] sm:$0xff]  }
 0x621   : > { %1550 = vmatprep.subr.bf16.mxu1 %v2263_v57 }
 0x624   : > { %v2234_v18 = vpop.permute.xlu1 %2233  ;;  %1551 = vmatpush1.bf16.msra.mxu1 %v2261_v58 }
 0x625   : > { %v2236_v44 = vunpack.i.h.bf16 %v2234_v18  ;;  %v2235_v22 = vunpack.i.l.bf16 %v2234_v18  ;;  %1552 = vmatprep.subr.bf16.mxu1 %v2266_v59  ;;  %v2270_v18 = vld [vmem:[%s2549_s2 + $0x78] sm:$0xff]  }
 0x626   : > { %2095 = vmatprep.subr.bf16.mxu0 %v2270_v18 }
 0x627   : > { %v1342_v0 = vsel %vm1340_vm9, %v1339_v24, %v2236_v44  ;;  %v1341_v28 = vsel %vm1340_vm9, %v1338_v25, %v2235_v22  ;;  %v2273_v44 = vld [vmem:[%s2549_s2 + $0x30] sm:$0xff]   ;;  %v2274_v22 = vld [vmem:[%s2549_s2 + $0x68] sm:$0xff]   ;;  %v2276_v24 = vld [vmem:[%s2549_s2 + $0x60] sm:$0xff]  }
 0x628   : > { %1553 = vmatpush1.bf16.msra.mxu1 %v2264_v60  ;;  %v2277_v25 = vld [vmem:[%s2549_s2 + $0x20] sm:$0xff]  }
 0x629   : > { %1554 = vmatprep.subr.bf16.mxu1 %v2269_v61 }
 0x62c   : > { %v2239_v23 = vpop.permute.xlu0 %2238  ;;  %1555 = vmatpush1.bf16.msra.mxu1 %v2267_v62 }
 0x62d   : > { %v2241_v26 = vunpack.i.h.bf16 %v2239_v23  ;;  %v2240_v27 = vunpack.i.l.bf16 %v2239_v23  ;;  %v2275_v23 = vld [vmem:[%s2549_s2 + $0x28] sm:$0xff]  }
 0x62f   : > { %v1345_v29 = vsel %vm1343_vm10, %v1342_v0, %v2241_v26  ;;  %v1344_v30 = vsel %vm1343_vm10, %v1341_v28, %v2240_v27  ;;  %v2278_v26 = vld [vmem:[%s2549_s2 + $0x58] sm:$0xff]   ;;  %v2280_v0 = vld [vmem:[%s2549_s2 + $0x50] sm:$0xff]  }
 0x630   : > { %v1346_v31 = vpack.c.bf16 %v1345_v29, %v1344_v30  ;;  %v2279_v27 = vld [vmem:[%s2549_s2 + $0x18] sm:$0xff]   ;;  %v2281_v28 = vld [vmem:[%s2549_s2 + $0x10] sm:$0xff]   ;;  %v2282_v29 = vld [vmem:[%s2549_s2 + $0x48] sm:$0xff]  }
 0x631   : > { %v2283_v30 = vld [vmem:[%s2549_s2 + $0x8] sm:$0xff]  }
 0x632   : > { %2174 = vmatmul.mubr.msk.bf16.vlgmr.msra.gmra.mxu0 %vm666_vm2, %v1346_v31  ;;  %v2284_v31 = vld [vmem:[%s2549_s2 + $0x40] sm:$0xff]  }
 0x633   : > { %2096 = vmatpush3.bf16.msra.mxu0 %v2271_v19 }
 0x634   : > { %2097 = vmatprep.subr.bf16.mxu0 %v2272_v21 }
 0x637   : > { %2098 = vmatpush3.bf16.msra.mxu0 %v2273_v44 }
 0x638   : > { %2099 = vmatprep.subr.bf16.mxu0 %v2274_v22  ;;  %v2049_v22 = vld [vmem:[%s645_s22] ss:$0 sm:$0xff] }
 0x63b   : > { %2100 = vmatpush3.bf16.msra.mxu0 %v2275_v23 }
 0x63c   : > { %2101 = vmatprep.subr.bf16.mxu0 %v2276_v24 }
 0x63f   : > { %2102 = vmatpush3.bf16.msra.mxu0 %v2277_v25 }
 0x640   : > { %2103 = vmatprep.subr.bf16.mxu0 %v2278_v26 }
 0x643   : > { %2104 = vmatpush3.bf16.msra.mxu0 %v2279_v27 }
 0x644   : > { %2105 = vmatprep.subr.bf16.mxu0 %v2280_v0 }
 0x647   : > { %2106 = vmatpush3.bf16.msra.mxu0 %v2281_v28 }
 0x648   : > { %2107 = vmatprep.subr.bf16.mxu0 %v2282_v29 }
 0x64b   : > { %2108 = vmatpush3.bf16.msra.mxu0 %v2283_v30 }
 0x64c   : > { %2109 = vmatprep.subr.bf16.mxu0 %v2284_v31 }
 0x6f2   : > { %v1423_v33 = vpop.f32.mrf.mxu0 }
 0x6f3   : > { %v1424_v34 = vadd.f32 %v2032_v32, %v1423_v33  ;;  %v1485_v33 = vld [vmem:[%s2539_s20] sm:$0x3] }
 0x6f4   : > { %v2175_v35 = vpop.f32.mrf.mxu0 }
 0x6f5   : > { %v2708_v36 = vadd.f32 %v1424_v34, %v2560_v2  ;;  %v1490_v34 = vrot.slane %v1485_v33, %v724_v45  ;;  %v1494_v35 = vrot.slane %v1485_v33, %v728_v54 }
 0x6f6   : > { %v1426_v37 = vpop.f32.mrf.mxu0 }
 0x6f7   : > { %v1427_v38 = vadd.f32 %v2032_v32, %v1426_v37  ;;  %v1434_v39 = vsel %vm666_vm2, %v2708_v36, 0.0  ;;  %v2285_v32 = vld [vmem:[%s2549_s2] sm:$0xff]  }
 0x6f8   : > { %1435 = vadd.xlane.f32.xlu1 %v1434_v39  ;;  %v2176_v40 = vpop.f32.mrf.mxu0  ;;  %2110 = vmatpush3.bf16.msra.mxu0 %v2285_v32 }
 0x6f9   : > { %v2713_v41 = vadd.f32 %v1427_v38, %v2563_v3 }
 0x6fb   : > { %v1437_v42 = vsel %vm670_vm3, %v2713_v41, 0.0 }
 0x6fc   : > { %1438 = vadd.xlane.f32.xlu0 %v1437_v42 }
 0x781   : > { %v1436_v46 = vpop.xlane.xlu1 %1435 }
 0x782   : > { %v1440_v2 = vmul.f32 0.015625, %v1436_v46 }
 0x784   : > { %v1442_v47 = vsub.f32 %v2708_v36, %v1440_v2 }
 0x785   : > { %v1439_v48 = vpop.xlane.xlu0 %1438 }
 0x786   : > { %v1441_v49 = vmul.f32 0.015625, %v1439_v48  ;;  %v1444_v50 = vmul.f32 %v1442_v47, %v1442_v47 }
 0x788   : > { %v1443_v51 = vsub.f32 %v2713_v41, %v1441_v49  ;;  %v1446_v3 = vsel %vm666_vm2, %v1444_v50, 0.0 }
 0x789   : > { %1447 = vadd.xlane.f32.xlu0 %v1446_v3 }
 0x78a   : > { %v1445_v52 = vmul.f32 %v1443_v51, %v1443_v51 }
 0x78c   : > { %v1449_v53 = vsel %vm670_vm3, %v1445_v52, 0.0 }
 0x78d   : > { %1450 = vadd.xlane.f32.xlu0 %v1449_v53 }
 0x812   : > { %v1448_v1 = vpop.xlane.xlu0 %1447 }
 0x813   : > { %v1452_v4 = vmul.f32 0.015625, %v1448_v1 }
 0x815   : > { %v1454_v63 = vadd.f32 1e-06, %v1452_v4 }
 0x816   : > { %v1451_v5 = vpop.xlane.xlu0 %1450 }
 0x817   : > { %2322 = vrsqrt.f32 %v1454_v63  ;;  %v1453_v6 = vmul.f32 0.015625, %v1451_v5 }
 0x819   : > { %v1455_v20 = vadd.f32 1e-06, %v1453_v6 }
 0x81b   : > { %2324 = vrsqrt.f32 %v1455_v20 }
 0x824   : > { %v2323_v7 = vpop.eup %2322 }
 0x825   : > { %v1458_v8 = vmul.f32 %v2323_v7, %v1442_v47 }
 0x827   : > { %v1466_v13 = vmul.f32 %v2038_v9, %v1458_v8 }
 0x828   : > { %v2325_v10 = vpop.eup %2324 }
 0x829   : > { %v1459_v12 = vmul.f32 %v2325_v10, %v1443_v51  ;;  %v1474_v11 = vadd.f32 %v2039_v14, %v1466_v13 }
 0x82b   : > { %v1467_v15 = vmul.f32 %v2038_v9, %v1459_v12 }
 0x82d   : > { %v1475_v16 = vadd.f32 %v2039_v14, %v1467_v15 }
 0x82f   : > { %v1476_v17 = vpack.c.bf16 %v1475_v16, %v1474_v11 }
 0x831   : > { %2048 = vmatmul.mubr.msk.bf16.vlgmr.msra.gmra.mxu1 %vm666_vm2, %v1476_v17 }
 0x8f1   : > { %v1574_v37 = vpop.f32.mrf.mxu1 }
 0x8f2   : > { %v1575_v38 = vadd.f32 %v1574_v37, %v1490_v34 }
 0x8f3   : > { %v1576_v39 = vpop.f32.mrf.mxu1 }
 0x8f4   : > { %v1587_v40 = vmul.f32 0.044715, %v1575_v38  ;;  %v1577_v42 = vadd.f32 %v1576_v39, %v1494_v35  ;;  %v1583_v15 = vmul.f32 0.5, %v1575_v38 }
 0x8f5   : > { %v1578_v46 = vpop.f32.mrf.mxu1 }
 0x8f6   : > { %v1591_v2 = vmul.f32 %v1587_v40, %v1575_v38  ;;  %v1588_v47 = vmul.f32 0.044715, %v1577_v42  ;;  %v1579_v48 = vadd.f32 %v1578_v46, %v1490_v34  ;;  %v1584_v12 = vmul.f32 0.5, %v1577_v42 }
 0x8f7   : > { %v1580_v49 = vpop.f32.mrf.mxu1 }
 0x8f8   : > { %v1595_v50 = vmul.f32 %v1591_v2, %v1575_v38  ;;  %v1592_v51 = vmul.f32 %v1588_v47, %v1577_v42  ;;  %v1589_v3 = vmul.f32 0.044715, %v1579_v48  ;;  %v1581_v52 = vadd.f32 %v1580_v49, %v1494_v35 }
 0x8f9   : > { %v1585_v9 = vmul.f32 0.5, %v1579_v48 }
 0x8fa   : > { %v1599_v53 = vadd.f32 %v1595_v50, %v1575_v38  ;;  %v1596_v55 = vmul.f32 %v1592_v51, %v1577_v42  ;;  %v1593_v45 = vmul.f32 %v1589_v3, %v1579_v48  ;;  %v1590_v56 = vmul.f32 0.044715, %v1581_v52 }
 0x8fb   : > { %v1586_v13 = vmul.f32 0.5, %v1581_v52 }
 0x8fc   : > { %v1597_v43 = vmul.f32 %v1593_v45, %v1579_v48  ;;  %v1594_v54 = vmul.f32 %v1590_v56, %v1581_v52  ;;  %v1600_v57 = vadd.f32 %v1596_v55, %v1577_v42  ;;  %v1603_v58 = vmul.f32 0.7978846, %v1599_v53 }
 0x8fe   : > { %v1601_v59 = vadd.f32 %v1597_v43, %v1579_v48  ;;  %v1598_v60 = vmul.f32 %v1594_v54, %v1581_v52  ;;  %v1604_v61 = vmul.f32 0.7978846, %v1600_v57 }
 0x900   : > { %v1605_v62 = vmul.f32 0.7978846, %v1601_v59  ;;  %v1602_v1 = vadd.f32 %v1598_v60, %v1581_v52  ;;  %2326 = vtanh.f32 %v1604_v61 }
 0x901   : > { %2328 = vtanh.f32 %v1603_v58 }
 0x902   : > { %2330 = vtanh.f32 %v1605_v62  ;;  %v1606_v4 = vmul.f32 0.7978846, %v1602_v1 }
 0x904   : > { %2332 = vtanh.f32 %v1606_v4 }
 0x90d   : > { %v2327_v63 = vpop.eup %2326 }
 0x90e   : > { %v2329_v5 = vpop.eup %2328  ;;  %v1612_v20 = vadd.f32 1.0, %v2327_v63 }
 0x90f   : > { %v2331_v6 = vpop.eup %2330  ;;  %v1611_v10 = vadd.f32 1.0, %v2329_v5 }
 0x910   : > { %v1613_v7 = vadd.f32 1.0, %v2331_v6  ;;  %v1616_v16 = vmul.f32 %v1612_v20, %v1584_v12 }
 0x911   : > { %v2333_v8 = vpop.eup %2332  ;;  %v1615_v18 = vmul.f32 %v1611_v10, %v1583_v15 }
 0x912   : > { %v1614_v14 = vadd.f32 1.0, %v2333_v8  ;;  %v1617_v11 = vmul.f32 %v1613_v7, %v1585_v9 }
 0x914   : > { %v1618_v17 = vmul.f32 %v1614_v14, %v1586_v13  ;;  %v1619_v21 = vpack.c.bf16 %v1617_v11, %v1615_v18 }
 0x916   : > { %v1620_v19 = vpack.c.bf16 %v1618_v17, %v1616_v16 }
 0x918   : > { %1788 = vmatprep.mubr.bf16.mxu0 %v1620_v19 }
 0x919   : > { %1789 = vmatmul.mubr.bf16.vlgmr.msra.gmra.mxu0 %v1619_v21 }
 0x9d9   : > { %v2111_v44 = vpop.f32.mrf.mxu0 }
 0x9db   : > { %v2112_v23 = vpop.f32.mrf.mxu0 }
 0x9dc   : > { %v2113_v24 = vadd.f32 %v2112_v23, %v2111_v44 }
 0x9dd   : > { %v2114_v25 = vpop.f32.mrf.mxu0 }
 0x9de   : > { %v1791_v26 = vadd.f32 %v2113_v24, %v2049_v22 }
 0x9df   : > { %v2115_v27 = vpop.f32.mrf.mxu0 }
 0x9e0   : > { %v1797_v0 = vadd.f32 %v1791_v26, %v2708_v36  ;;  %v2116_v28 = vadd.f32 %v2115_v27, %v2114_v25 }
 0x9e2   : > { %1799 = vst.msk [vmem:[%s2554_s30] sm:$0xff] %vm666_vm2, %v1797_v0  ;;  %v1794_v29 = vadd.f32 %v2116_v28, %v2049_v22 }
 0x9e4   : > { %v1798_v30 = vadd.f32 %v1794_v29, %v2713_v41 }
 0x9e6   : > { %1800 = vst.msk [vmem:[%s2554_s30 + $0x8] sm:$0x3] %vm670_vm3, %v1798_v30 }
 0x9e7 PF: > { %s2830_s0 = sld [smem:[#allocation5_spill]] }
 0x9e8   : > { %s2831_s25 = sld [smem:[#allocation3_spill]] }
 0x9e9   : > { %s2832_s26 = sld [smem:[#allocation4_spill]] }
 0x9ea   : > { %s2833_s27 = sld [smem:[#allocation6_spill]] }
 0x9eb   : > { %s2834_s28 = sld [smem:[#allocation7_spill]] }
 0x9ed   : > { %s23_s29 = sadd.s32 1, %s2830_s0  }
 0x9ee   : > { %p20_p8 = scmp.ge.s32.totalorder %s23_s29, 6  }
 0x9f0   :  { %22 = sbr.rel (!%p20_p8) target bundleno = 6 (0x6), region = 142 }

</bundles_post_ra>
